<compile_context>
chip_gen: v7x
topology: tpu7x:2x2x1
jax: 0.10.0
libtpu: 0.0.40
codegen_flags: <defaults>
</compile_context>

<pallas_src>
import math

import jax
import jax.numpy as jnp
from jax import lax
from jax.experimental import pallas as pl
from jax.experimental.pallas import tpu as pltpu


# --------------------------------------------------------------------------
# helpers
# --------------------------------------------------------------------------
def _round_up(v, m):
    return (v + m - 1) // m * m


def _pick_tile(n, candidates):
    """Largest candidate that divides n; fall back to n (full-dim block is legal)."""
    for t in candidates:
        if n >= t and n % t == 0:
            return t
    return n


def _vmem_limit(nbytes):
    # Size from the actual tile footprint; keep well below v7x's 64 MiB physical VMEM.
    return int(min(48 * 1024 * 1024, max(nbytes + (2 << 20), 8 << 20)))


def _positional_encoding(dim, max_len):
    position = jnp.arange(max_len, dtype=jnp.float32)[:, None]
    div_term = jnp.exp(
        jnp.arange(0, dim, 2, dtype=jnp.float32) * (-math.log(10000.0) / dim)
    )
    pe = jnp.zeros((max_len, dim), jnp.float32)
    pe = pe.at[:, 0::2].set(jnp.sin(position * div_term))
    pe = pe.at[:, 1::2].set(jnp.cos(position * div_term)[:, : dim // 2])  # odd-dim safe
    return pe


# --------------------------------------------------------------------------
# ViT patch embedding: per-batch (S, K) @ (K, C) with K-reduction grid axis.
# Output tile is the f32 accumulator (resident across the K axis); bias + PE
# are read from a small (S, C) table (never batch-broadcast in HBM).
# --------------------------------------------------------------------------
def _vit_pallas(patches, w_mat, bias_pe, *, ts, tk):
    """patches (B,S,K) bf16, w_mat (K,C) bf16, bias_pe (S,C) f32 -> (B,S,C) f32."""
    B, S, K = patches.shape
    C = w_mat.shape[1]

    def kernel(p_ref, w_ref, bpe_ref, o_ref):
        k = pl.program_id(2)

        @pl.when(k == 0)
        def _():
            o_ref[...] = jnp.zeros_like(o_ref)

        # bf16 MXU matmul, f32 accumulation directly in the resident output tile.
        o_ref[...] += jnp.dot(
            p_ref[...], w_ref[...], preferred_element_type=jnp.float32
        )

        @pl.when(k == pl.num_programs(2) - 1)
        def _():
            o_ref[...] += bpe_ref[...]  # fused conv bias + positional encoding

    vmem = 2 * (ts * tk * 2 + tk * C * 2 + ts * C * 4 + ts * C * 4)
    return pl.pallas_call(
        kernel,
        out_shape=jax.ShapeDtypeStruct((B, S, C), jnp.float32),
        grid=(B, S // ts, K // tk),
        in_specs=[
            pl.BlockSpec((None, ts, tk), lambda b, i, k: (b, i, k)),
            pl.BlockSpec((tk, C), lambda b, i, k: (k, 0)),
            pl.BlockSpec((ts, C), lambda b, i, k: (i, 0)),   # shared across batch
        ],
        out_specs=pl.BlockSpec((None, ts, C), lambda b, i, k: (b, i, 0)),
        compiler_params=pltpu.CompilerParams(
            dimension_semantics=("parallel", "parallel", "arbitrary"),
            vmem_limit_bytes=_vmem_limit(vmem),
        ),
    )(patches, w_mat, bias_pe)


# --------------------------------------------------------------------------
# Global average pool: tiled (C-chunk, HW-chunk) reduction, f32 accumulation
# resident in the output tile.
# --------------------------------------------------------------------------
def _gap_pallas(x):
    """x: (B, C, H, W) -> (B, C) mean over spatial dims."""
    B, C, H, W = x.shape
    HW = H * W
    xf = x.reshape(B, C, HW)                 # free reshape of contiguous NCHW
    inv = 1.0 / float(HW)

    tc = C if C <= 512 else _pick_tile(C, (512, 256, 128, 64, 32, 16, 8))
    # keep each (tc, thw) input buffer <= ~8 MiB so double-buffering fits every gen
    budget = 8 * 1024 * 1024
    max_thw = max(128, budget // (tc * x.dtype.itemsize))
    if HW <= max_thw:
        thw = HW
    else:
        cand = tuple(t for t in (32768, 16384, 8192, 4096, 2048, 1024, 512, 256, 128)
                     if t <= max_thw)
        thw = _pick_tile(HW, cand)
    n_c, n_hw = C // tc, HW // thw

    def kernel(x_ref, o_ref):
        h = pl.program_id(2)

        @pl.when(h == 0)
        def _():
            o_ref[...] = jnp.zeros_like(o_ref)

        o_ref[...] += jnp.sum(x_ref[...].astype(jnp.float32), axis=-1, keepdims=True)

        @pl.when(h == pl.num_programs(2) - 1)
        def _():
            o_ref[...] *= inv

    vmem = 2 * tc * thw * x.dtype.itemsize + 4 * tc * 4
    out = pl.pallas_call(
        kernel,
        out_shape=jax.ShapeDtypeStruct((B, C, 1), jnp.float32),
        grid=(B, n_c, n_hw),
        in_specs=[pl.BlockSpec((None, tc, thw), lambda b, c, h: (b, c, h))],
        out_specs=pl.BlockSpec((None, tc, 1), lambda b, c, h: (b, c, 0)),
        compiler_params=pltpu.CompilerParams(
            dimension_semantics=("parallel", "parallel", "arbitrary"),
            vmem_limit_bytes=_vmem_limit(vmem),
        ),
    )(xf)
    # the (tc, 1) per-block store is only 4*tc bytes -> negligible
    return out[..., 0].astype(x.dtype)


# --------------------------------------------------------------------------
# Bilinear grid_sample (zeros padding, align_corners=True — as in the reference)
# as a 4-tap gather, 8 queries per group (one dense (8, C) store per group).
# --------------------------------------------------------------------------
def _grid_sample_pallas(x, grid_uv):
    """x: (B, C, H, W), grid_uv: (B, N, S, 2) in [-1, 1] -> (B, N, S, C)."""
    B, C, H, W = x.shape
    _, N, S, _ = grid_uv.shape
    Q = N * S
    HW = H * W

    QB = 8                                              # queries per store tile
    Qp = _round_up(Q, QB)
    QC = Qp if Qp <= 1024 else _pick_tile(Qp, (1024, 512, 256, 128, 64, 32, 16, 8))
    n_qc = Qp // QC
    n_groups = QC // QB

    # glue: channel-last (HW, C) feature map; C is NOT padded (full-dim last block
    # is legal), so the dominant HBM->VMEM stream carries no pad bytes.
    xf = jnp.transpose(x, (0, 2, 3, 1)).reshape(B, HW, C)

    # glue: bilinear corner indices + weights (O(B*Q) elementwise). Zeros padding
    # is realised by zeroing the weight of out-of-range corners; indices are
    # clamped so the in-kernel gather always stays in bounds.
    gx = grid_uv[..., 0].reshape(B, Q).astype(jnp.float32)
    gy = grid_uv[..., 1].reshape(B, Q).astype(jnp.float32)
    ix = (gx + 1.0) * 0.5 * (W - 1)                     # align_corners=True
    iy = (gy + 1.0) * 0.5 * (H - 1)
    ix0, iy0 = jnp.floor(ix), jnp.floor(iy)
    ix1, iy1 = ix0 + 1.0, iy0 + 1.0
    wx1, wy1 = ix - ix0, iy - iy0
    wx0, wy0 = 1.0 - wx1, 1.0 - wy1

    def corner(cx, cy, w):
        valid = (cx >= 0.0) & (cx <= W - 1.0) & (cy >= 0.0) & (cy <= H - 1.0)
        idx = (
            jnp.clip(cy, 0.0, H - 1.0) * W + jnp.clip(cx, 0.0, W - 1.0)
        ).astype(jnp.int32)
        return idx, jnp.where(valid, w, 0.0)

    i00, w00 = corner(ix0, iy0, wx0 * wy0)
    i10, w10 = corner(ix1, iy0, wx1 * wy0)
    i01, w01 = corner(ix0, iy1, wx0 * wy1)
    i11, w11 = corner(ix1, iy1, wx1 * wy1)
    idx = jnp.stack([i00, i10, i01, i11], axis=-1)      # (B, Q, 4) int32
    wgt = jnp.stack([w00, w10, w01, w11], axis=-1)      # (B, Q, 4) f32
    if Qp != Q:
        idx = jnp.pad(idx, ((0, 0), (0, Qp - Q), (0, 0)))
        wgt = jnp.pad(wgt, ((0, 0), (0, Qp - Q), (0, 0)))
    # blocked per (batch, Q-chunk) -> SMEM usage bounded, independent of B*Q
    idx = idx.reshape(B, n_qc, QC * 4)
    wgt = wgt.reshape(B, n_qc, QC * 4)

    def kernel(idx_ref, wgt_ref, xf_ref, o_ref):
        def body(g, carry):
            q0 = pl.multiple_of(g * QB, QB)
            rows = []
            for qi in range(QB):                        # 8 queries x 4 taps, unrolled
                base = (q0 + qi) * 4
                r = (
                    wgt_ref[base + 0] * xf_ref[pl.ds(idx_ref[base + 0], 1), :]
                    + wgt_ref[base + 1] * xf_ref[pl.ds(idx_ref[base + 1], 1), :]
                    + wgt_ref[base + 2] * xf_ref[pl.ds(idx_ref[base + 2], 1), :]
                    + wgt_ref[base + 3] * xf_ref[pl.ds(idx_ref[base + 3], 1), :]
                )                                       # (1, C) f32
                rows.append(r)
            # one sublane-dense (QB, C) store per group instead of 8 masked row stores
            o_ref[pl.ds(q0, QB), :] = jnp.concatenate(rows, axis=0).astype(o_ref.dtype)
            return carry

        lax.fori_loop(0, n_groups, body, 0)

    vmem = 2 * HW * C * x.dtype.itemsize + 2 * QC * C * x.dtype.itemsize
    out = pl.pallas_call(
        kernel,
        out_shape=jax.ShapeDtypeStruct((B, Qp, C), x.dtype),
        grid=(B, n_qc),
        in_specs=[
            pl.BlockSpec((None, None, QC * 4), lambda b, qc: (b, qc, 0),
                         memory_space=pltpu.MemorySpace.SMEM),
            pl.BlockSpec((None, None, QC * 4), lambda b, qc: (b, qc, 0),
                         memory_space=pltpu.MemorySpace.SMEM),
            # feature-map block index is constant across qc -> fetched once per batch
            pl.BlockSpec((None, HW, C), lambda b, qc: (b, 0, 0)),
        ],
        out_specs=pl.BlockSpec((None, QC, C), lambda b, qc: (b, qc, 0)),
        compiler_params=pltpu.CompilerParams(
            dimension_semantics=("parallel", "parallel"),
            vmem_limit_bytes=_vmem_limit(vmem),
        ),
    )(idx, wgt, xf)
    # TODO(synk): for very large H*W keep the feature map in HBM (memory_space=pl.ANY)
    # and DMA only the gathered rows with manual double-buffering.
    return out[:, :Q, :].reshape(B, N, S, C)


# --------------------------------------------------------------------------
# Model wrapper mirroring Image_feature_extractor_model
# --------------------------------------------------------------------------
class ImageFeatureExtractorModel:
    PATCH = 16

    def __init__(self, extractor_name, img_feature_dim, down_scale, num_vec=8, key=None):
        self.name = extractor_name
        self.down_scale = down_scale
        if key is None:
            key = jax.random.PRNGKey(0)

        if extractor_name == "ViT_feature":
            kw, kb = jax.random.split(key)
            dim = img_feature_dim
            # nn.Conv2d(dim, dim, 16, 16, 0): weight (dim, dim, 16, 16), bias (dim,)
            self.conv_w = jax.random.normal(kw, (dim, dim, 16, 16), jnp.float32) * 0.02
            self.conv_b = jax.random.normal(kb, (dim,), jnp.float32) * 0.02
            self.pe = _positional_encoding(dim, max_len=256)
        elif extractor_name == "query_uv_feature":
            pass  # no learned parameters
        elif extractor_name == "query_uv_feature_with_PE":
            if img_feature_dim == 0:
                raise ValueError("Invalid dim")  # mirrors query_uv_extractor.__init__
            # PositionalEncoding built in the reference is never used in forward.
        elif "gap" in extractor_name:
            pass
        elif ("softargmax_uv" in extractor_name) or ("softargmax_feature" in extractor_name):
            raise ValueError("TODO: now coding")  # mirrors the PyTorch reference
        else:
            raise ValueError(
                f"Invalid key: {extractor_name} is invalid key for the "
                "Image-feature_extractor_model"
            )

    def __call__(self, x, uv):
        output_dict = {}
        debug_info = {}
        B, C, H, W = x.shape
        N = uv.shape[1]

        if self.name == "ViT_feature":
            P = self.PATCH
            Hp, Wp = H // P, W // P
            S = Hp * Wp
            K = C * P * P

            # glue: non-overlapping 16x16 patches, channel-major flattening matching
            # PyTorch OIHW weight flattening; bf16 cast fused into the same expression
            # (single pass over x).
            patches = (
                x.reshape(B, C, Hp, P, Wp, P)
                .transpose(0, 2, 4, 1, 3, 5)
                .reshape(B, S, K)
                .astype(jnp.bfloat16)
            )
            w_mat = self.conv_w.reshape(C, K).T.astype(jnp.bfloat16)       # (K, C)
            bias_pe = (self.pe[:S] + self.conv_b[None, :]).astype(jnp.float32)  # (S, C)

            # tiling: large S tile to fill the 256-wide MXU on v6e/v7x, K tiled as
            # the reduction axis; footprint stays a few MiB.
            ts = S if S <= 1024 else _pick_tile(S, (1024, 512, 256, 128, 64, 32, 16, 8))
            tk = K if K <= 4096 else _pick_tile(K, (4096, 2048, 1024, 512, 256, 128))

            tok = _vit_pallas(patches, w_mat, bias_pe, ts=ts, tk=tk)  # (B, S, C) f32
            # dropout is identity (eval mode); repeat 'B S C -> B N S C'
            output_dict["img_feature"] = jnp.broadcast_to(tok[:, None], (B, N, S, C))
        elif self.name in ("query_uv_feature", "query_uv_feature_with_PE"):
            output_dict["img_feature"] = _grid_sample_pallas(x, uv)
        else:  # gap
            pooled = _gap_pallas(x)                                   # (B, C)
            output_dict["img_feature"] = jnp.broadcast_to(pooled[:, None], (B, N, C))

        return output_dict, debug_info


# --------------------------------------------------------------------------
# Pure-JAX references (sanity checks only)
# --------------------------------------------------------------------------
def _vit_reference(x, w, b, pe, N):
    y = jax.lax.conv_general_dilated(
        x, w, window_strides=(16, 16), padding="VALID",
        dimension_numbers=("NCHW", "OIHW", "NCHW"),
        precision=jax.lax.Precision.HIGHEST,
    ) + b[None, :, None, None]
    B, C, Hp, Wp = y.shape
    S = Hp * Wp
    tok = y.reshape(B, C, S).transpose(0, 2, 1) + pe[None, :S]
    return jnp.broadcast_to(tok[:, None], (B, N, S, C))


def _grid_sample_reference(x, grid):
    B, C, H, W = x.shape
    _, N, S, _ = grid.shape
    gx, gy = grid[..., 0], grid[..., 1]
    ix = (gx + 1.0) * 0.5 * (W - 1)
    iy = (gy + 1.0) * 0.5 * (H - 1)
    ix0, iy0 = jnp.floor(ix), jnp.floor(iy)
    ix1, iy1 = ix0 + 1.0, iy0 + 1.0
    wx1, wy1 = ix - ix0, iy - iy0
    wx0, wy0 = 1.0 - wx1, 1.0 - wy1
    xf = x.reshape(B, C, H * W)

    def gather(cx, cy, wgt):
        valid = (cx >= 0) & (cx <= W - 1) & (cy >= 0) & (cy <= H - 1)
        idx = (jnp.clip(cy, 0, H - 1) * W + jnp.clip(cx, 0, W - 1)).astype(jnp.int32)
        v = jnp.take_along_axis(xf, idx.reshape(B, 1, N * S), axis=2).reshape(B, C, N, S)
        return v * (wgt * valid.astype(wgt.dtype))[:, None]

    out = (
        gather(ix0, iy0, wx0 * wy0)
        + gather(ix1, iy0, wx1 * wy0)
        + gather(ix0, iy1, wx0 * wy1)
        + gather(ix1, iy1, wx1 * wy1)
    )
    return out.transpose(0, 2, 3, 1)  # B N S C


# --------------------------------------------------------------------------
if __name__ == "__main__":
    key = jax.random.PRNGKey(0)
    kx, ky, kp = jax.random.split(key, 3)
    B, C, H, W, N, S = 2, 32, 32, 32, 3, 8

    x = jax.random.normal(kx, (B, C, H, W), dtype=jnp.float32)
    # range slightly beyond [-1, 1] to exercise the zeros-padding path
    uv = jax.random.uniform(ky, (B, N, S, 2), dtype=jnp.float32, minval=-1.2, maxval=1.2)

    # --- ViT_feature (patch conv as bf16 MXU matmul + fused bias/PE) ---
    m_vit = ImageFeatureExtractorModel("ViT_feature", img_feature_dim=C, down_scale=16, key=kp)
    out_vit, _ = m_vit(x, uv)
    jax.block_until_ready(out_vit["img_feature"])
    assert out_vit["img_feature"].shape == (B, N, (H // 16) * (W // 16), C)
    ref_vit = _vit_reference(x, m_vit.conv_w, m_vit.conv_b, m_vit.pe, N)
    assert jnp.allclose(out_vit["img_feature"], ref_vit, atol=5e-2, rtol=5e-2)

    # --- gap (tiled global average pool) ---
    m_gap = ImageFeatureExtractorModel("gap", img_feature_dim=C, down_scale=16)
    out_gap, _ = m_gap(x, uv)
    jax.block_until_ready(out_gap["img_feature"])
    ref_gap = jnp.broadcast_to(jnp.mean(x, axis=(2, 3))[:, None], (B, N, C))
    assert jnp.allclose(out_gap["img_feature"], ref_gap, atol=1e-4, rtol=1e-4)

    # --- query_uv_feature (bilinear grid_sample as grouped 4-tap gather) ---
    m_q = ImageFeatureExtractorModel("query_uv_feature", img_feature_dim=C, down_scale=16)
    out_q, _ = m_q(x, uv)
    jax.block_until_ready(out_q["img_feature"])
    assert out_q["img_feature"].shape == (B, N, S, C)
    ref_q = _grid_sample_reference(x, uv)
    assert jnp.allclose(out_q["img_feature"], ref_q, atol=1e-3, rtol=1e-3)

    print("KERNEL_OK")
</pallas_src>

<mosaic_0001>
module attributes {stable_mosaic.version = 11 : i64} {
  func.func @kernel(%arg0: i32, %arg1: i32, %arg2: i32, %arg3: memref<1x4x4096xbf16, #tpu.memory_space<vmem>>, %arg4: memref<4096x32xbf16, #tpu.memory_space<vmem>>, %arg5: memref<4x32xf32, #tpu.memory_space<vmem>>, %arg6: memref<1x4x32xf32, #tpu.memory_space<vmem>>) attributes {dimension_semantics = [#tpu.dimension_semantics<parallel>, #tpu.dimension_semantics<parallel>, #tpu.dimension_semantics<arbitrary>], iteration_bounds = array<i64: 2, 1, 2>, scalar_prefetch = 0 : i64, scratch_operands = 0 : i64, tpu.core_type = #tpu.core_type<tc>, window_params = [{transform_indices = @transform_0, window_bounds = array<i64: 1, 4, 4096>}, {transform_indices = @transform_1, window_bounds = array<i64: 4096, 32>}, {transform_indices = @transform_2, window_bounds = array<i64: 4, 32>}, {transform_indices = @transform_3, window_bounds = array<i64: 1, 4, 32>}]} {
    %c0_i32 = arith.constant 0 : i32
    %0 = arith.cmpi eq, %arg2, %c0_i32 : i32
    %1 = arith.extui %0 : i1 to i32
    %c0_i32_0 = arith.constant 0 : i32
    %2 = arith.cmpi ne, %1, %c0_i32_0 : i32
    scf.if %2 {
      %cst_12 = arith.constant 0.000000e+00 : f32
      %16 = vector.broadcast %cst_12 : f32 to vector<4x32xf32>
      %c0_13 = arith.constant 0 : index
      %c0_14 = arith.constant 0 : index
      %c0_15 = arith.constant 0 : index
      %17 = vector.load %arg6[%c0_13, %c0_14, %c0_15] : memref<1x4x32xf32, #tpu.memory_space<vmem>>, vector<1x4x32xf32>
      %18 = vector.shape_cast %17 : vector<1x4x32xf32> to vector<4x32xf32>
      %19 = vector.shape_cast %16 : vector<4x32xf32> to vector<1x4x32xf32>
      tpu.vector_store %arg6[%c0_13, %c0_14, %c0_15], %19 {strides = array<i32>} : memref<1x4x32xf32, #tpu.memory_space<vmem>>, vector<1x4x32xf32>,
    } else {
    }
    %c0 = arith.constant 0 : index
    %c0_1 = arith.constant 0 : index
    %c0_2 = arith.constant 0 : index
    %3 = vector.load %arg6[%c0, %c0_1, %c0_2] : memref<1x4x32xf32, #tpu.memory_space<vmem>>, vector<1x4x32xf32>
    %4 = vector.shape_cast %3 : vector<1x4x32xf32> to vector<4x32xf32>
    %c0_3 = arith.constant 0 : index
    %c0_4 = arith.constant 0 : index
    %c0_5 = arith.constant 0 : index
    %5 = vector.load %arg3[%c0_3, %c0_4, %c0_5] : memref<1x4x4096xbf16, #tpu.memory_space<vmem>>, vector<1x4x4096xbf16>
    %6 = vector.shape_cast %5 : vector<1x4x4096xbf16> to vector<4x4096xbf16>
    %c0_6 = arith.constant 0 : index
    %c0_7 = arith.constant 0 : index
    %7 = vector.load %arg4[%c0_6, %c0_7] : memref<4096x32xbf16, #tpu.memory_space<vmem>>, vector<4096x32xbf16>
    %cst = arith.constant dense<0.000000e+00> : vector<4x32xf32>
    %8 = tpu.matmul %6, %7, %cst {dimension_numbers = #tpu.dot_dimension_numbers<[1], [0], [0], [1], [0, 0, 1, 1], [], []>} : vector<4x4096xbf16>, vector<4096x32xbf16>, vector<4x32xf32> -> vector<4x32xf32>
    %9 = arith.addf %4, %8 : vector<4x32xf32>
    %c0_8 = arith.constant 0 : index
    %c0_9 = arith.constant 0 : index
    %c0_10 = arith.constant 0 : index
    %10 = vector.load %arg6[%c0_8, %c0_9, %c0_10] : memref<1x4x32xf32, #tpu.memory_space<vmem>>, vector<1x4x32xf32>
    %11 = vector.shape_cast %10 : vector<1x4x32xf32> to vector<4x32xf32>
    %12 = vector.shape_cast %9 : vector<4x32xf32> to vector<1x4x32xf32>
    tpu.vector_store %arg6[%c0_8, %c0_9, %c0_10], %12 {strides = array<i32>} : memref<1x4x32xf32, #tpu.memory_space<vmem>>, vector<1x4x32xf32>,
    %c1_i32 = arith.constant 1 : i32
    %13 = arith.cmpi eq, %arg2, %c1_i32 : i32
    %14 = arith.extui %13 : i1 to i32
    %c0_i32_11 = arith.constant 0 : i32
    %15 = arith.cmpi ne, %14, %c0_i32_11 : i32
    scf.if %15 {
      %c0_12 = arith.constant 0 : index
      %c0_13 = arith.constant 0 : index
      %c0_14 = arith.constant 0 : index
      %16 = vector.load %arg6[%c0_12, %c0_13, %c0_14] : memref<1x4x32xf32, #tpu.memory_space<vmem>>, vector<1x4x32xf32>
      %17 = vector.shape_cast %16 : vector<1x4x32xf32> to vector<4x32xf32>
      %c0_15 = arith.constant 0 : index
      %c0_16 = arith.constant 0 : index
      %18 = vector.load %arg5[%c0_15, %c0_16] : memref<4x32xf32, #tpu.memory_space<vmem>>, vector<4x32xf32>
      %19 = arith.addf %17, %18 : vector<4x32xf32>
      %c0_17 = arith.constant 0 : index
      %c0_18 = arith.constant 0 : index
      %c0_19 = arith.constant 0 : index
      %20 = vector.load %arg6[%c0_17, %c0_18, %c0_19] : memref<1x4x32xf32, #tpu.memory_space<vmem>>, vector<1x4x32xf32>
      %21 = vector.shape_cast %20 : vector<1x4x32xf32> to vector<4x32xf32>
      %22 = vector.shape_cast %19 : vector<4x32xf32> to vector<1x4x32xf32>
      tpu.vector_store %arg6[%c0_17, %c0_18, %c0_19], %22 {strides = array<i32>} : memref<1x4x32xf32, #tpu.memory_space<vmem>>, vector<1x4x32xf32>,
    } else {
    }
    return
  }
  func.func @transform_0(%arg0: i32, %arg1: i32, %arg2: i32) -> (i32, i32, i32) {
    %c0_i32 = arith.constant 0 : i32
    return %arg0, %arg1, %arg2 : i32, i32, i32
  }
  func.func @transform_1(%arg0: i32, %arg1: i32, %arg2: i32) -> (i32, i32) {
    %c0_i32 = arith.constant 0 : i32
    %c0_i32_0 = arith.constant 0 : i32
    return %arg2, %c0_i32 : i32, i32
  }
  func.func @transform_2(%arg0: i32, %arg1: i32, %arg2: i32) -> (i32, i32) {
    %c0_i32 = arith.constant 0 : i32
    %c0_i32_0 = arith.constant 0 : i32
    return %arg1, %c0_i32 : i32, i32
  }
  func.func @transform_3(%arg0: i32, %arg1: i32, %arg2: i32) -> (i32, i32, i32) {
    %c0_i32 = arith.constant 0 : i32
    %c0_i32_0 = arith.constant 0 : i32
    return %arg0, %arg1, %c0_i32 : i32, i32, i32
  }
}

</mosaic_0001>

<bundles_post_ra>
// kernel: tpu_custom_call.1
= control target key start
LH: loop header
LB: loop body
LE: loop exit
PB: predicated region body
PF: predicated region fallthrough
CT: control target
= control target key end

     0   :  { %8 = vsyncpa [#allocation3], 0  ;;  %s4794_s0 = inlined_call_operand.vmem [shape: bf16[2,4,8192], index: 0, kind: input, shape index: {}]   ;;  %s4795_s1 = inlined_call_operand.vmem [shape: bf16[8192,32], index: 1, kind: input, shape index: {}]   ;;  %s4796_s2 = inlined_call_operand.vmem [shape: f32[4,32], index: 2, kind: input, shape index: {}]   ;;  %s4797_s3 = inlined_call_operand.hbm [shape: f32[2,4,32], index: 3, kind: output, shape index: {}]  }
   0x1   :  { %10 = vsyncpa [#allocation3 + $0x1], 0  ;;  %s4360_s12 = smov 0   ;;  %s4362_s13 = smov 0  }
   0x2   :  { %s4364_s14 = smov 0   ;;  %s4366_s15 = smov 0  }
   0x3   :  { %s4368_s16 = smov 0   ;;  %s4370_s17 = smov 0  }
   0x4   :  { %s4372_s18 = smov 0   ;;  %s4374_s19 = smov 0  }
   0x5 LB: > { %s3278_s20 = sadd.s32 4294967295, %s4335_s19   ;;  %s3279_s21 = sadd.s32 4294967294, %s4335_s19   ;;  %s4335_s19 = sphi %s4374_s19, %s16_s19   ;;  %s4331_s18 = sphi %s4372_s18, %s4811_s18   ;;  %s4327_s17 = sphi %s4370_s17, %s4810_s17   ;;  %s4323_s16 = sphi %s4368_s16, %s4809_s16   ;;  %s4319_s15 = sphi %s4366_s15, %s4808_s15   ;;  %s4315_s14 = sphi %s4364_s14, %s4807_s14   ;;  %s4311_s13 = sphi %s4362_s13, %s4806_s13   ;;  %s4307_s12 = sphi %s4360_s12, %s4805_s12  }
   0x6   : > { %s28_s22 = sadd.s32 1, %s4327_s17  ;;  %s35_s23 = sadd.s32 1, %s4331_s18 }
   0x7   : > { %p29_p0 = scmp.ge.s32.totalorder %s28_s22, 2  ;;  %p136_p1 = scmp.ne.s32.totalorder %s4315_s14, %s4311_s13 }
   0x8   : > { %p137_p2 = scmp.eq.s32.totalorder %s3278_s20, 3  ;;  %p142_p4 = scmp.ne.s32.totalorder %s4311_s13, %s4307_s12 }
   0x9   : > { %s4813_s22 = smov (%p29_p0, %s28_s22), 0  ;;  %s4815_s23 = smov (!%p29_p0, %s35_s23), %s4331_s18 }
   0xa   : > { %p4409_p3 = por %p137_p2, %p136_p1  ;;  %p37_p5 = scmp.ge.s32.totalorder %s4815_s23, 2 }
   0xb   : > { %p143_p6 = scmp.eq.s32.totalorder %s3279_s21, 3  ;;  %p3283_p7 = scmp.ge.s32.totalorder %s4335_s19, 1 }
   0xc   : > { %p194_p8 = scmp.lt.s32.totalorder %s4335_s19, 5  ;;  %s4817_s23 = smov (%p37_p5, %s4815_s23), 0 }
   0xd   : > { %4801 = sst [smem:[#allocation5_spill]] %s4817_s23  ;;  %p4419_p9 = por %p143_p6, %p142_p4 }
   0xe   : > { %p195_p10 = pnand %p3283_p7, %p194_p8  ;;  %s121_s26 = ssub.s32 %s4331_s18, %s4817_s23 }
   0xf   : > { %s126_s27 = sadd.s32 1, %s4315_s14  ;;  %p124_p11 = scmp.eq.s32.totalorder %s121_s26, 0 }
  0x10   : > { %198 = sbr.rel (%p195_p10) target bundleno = 549 (0x225), region = 32  ;;  %s4798_s29 = sand.u32 (!%p195_p10), 1, %s4311_s13  }
  0x11   : > { %s4427_s28 = scalar_select %p124_p11, %s4315_s14, %s126_s27  }
  0x12   : > { %s3285_s30 = sshll.u32 (!%p195_p10), %s4319_s15, 5  ;;  %s3284_s4 = sshll.u32 (!%p195_p10), %s4798_s29, 2 }
  0x13   : > { %p236_p12 = scmp.lt.s32.totalorder (!%p195_p10), %s4323_s16, 1  ;;  %p240_p13 = scmp.lt.s32.totalorder (!%p195_p10), %s3285_s30, 63 }
  0x14   : > { %s3288_s7 = sshll.u32 (!%p195_p10), %s4319_s15, 9  ;;  %s4446_s23 = scalar_lea.vmem (!%p195_p10), [#allocation2], %s3284_s4 }
  0x15   : > { %p250_p0 = scmp.lt.s32.totalorder (!%p195_p10), %s3288_s7, 1023  ;;  %p3290_p1 = scmp.ne.s32.totalorder (!%p195_p10), %s4319_s15, 0 }
  0x17   : > { %s237_s5 = scalar_select %p236_p12, %s4323_s16, 1 }
  0x18   : > { %s4819_s30 = smov (!%p240_p13, %s3285_s30), 63  ;;  %s4821_s7 = smov (!%p250_p0, %s3288_s7), 1023 }
  0x19   : > { %s3286_s6 = sshll.u32 %s237_s5, 6  ;;  %s3289_s21 = sshll.u32 %s4821_s7, 2  ;;  %vm264_vm0 = vcmask (!%p3290_p1), 257024   ;;  %v4337_v0 = vmov (!%p3290_p1), 0.0  }
  0x1a   : > { %s245_s8 = sadd.s32 %s3286_s6, %s4819_s30  ;;  %s4444_s29 = scalar_lea.vmem %s4795_s1, %s3289_s21  ;;  %265 = vst.msk [vmem:[%s4446_s23] sm:$0xf] (!%p3290_p1), %vm264_vm0, %v4337_v0 }
  0x1b   : > { %s3287_s9 = sshll.u32 %s245_s8, 1  ;;  %263 = sbr.rel (%p3290_p1) target bundleno = 34 (0x22), region = 36 }
  0x1c   : > { %s4439_s20 = scalar_lea.vmem %s4794_s0, %s3287_s9 }
  0x22 PF: > { %v3977_v1 = vld [vmem:[%s4444_s29 + $0x40] sm:$0xff]   ;;  %v3981_v5 = vld [vmem:[%s4444_s29 + $0x48] sm:$0xff]   ;;  %v3985_v9 = vld [vmem:[%s4444_s29 + $0x50] sm:$0xff]   ;;  %v799_v29 = vlaneseq  ;;  %v4338_v37 = vmov 1983009808   ;;  %vm3140_vm1 = vcmask 257024  }
  0x23   : > { %v3978_v2 = vld [vmem:[%s4444_s29 + $0xc0] sm:$0xff]   ;;  %3552 = vmatprep.subr.bf16.mxu0 %v3977_v1  ;;  %v3982_v6 = vld [vmem:[%s4444_s29 + $0xc8] sm:$0xff]   ;;  %v3986_v10 = vld [vmem:[%s4444_s29 + $0xd0] sm:$0xff]   ;;  %v797_v38 = vunpack.c.l.s4 %v4338_v37  ;;  %p3547_p2 = scmp.ne.s32.totalorder %s4319_s15, 1 }
  0x24   : > { %v3979_v3 = vld [vmem:[%s4444_s29] sm:$0xff]   ;;  %3574 = vmatprep.subr.bf16.mxu1 %v3978_v2  ;;  %v3983_v7 = vld [vmem:[%s4444_s29 + $0x8] sm:$0xff]   ;;  %v3987_v11 = vld [vmem:[%s4444_s29 + $0x10] sm:$0xff]   ;;  %v800_v34 = vshrl.u32 %v799_v29, 7 }
  0x25   : > { %v3980_v4 = vld [vmem:[%s4444_s29 + $0x80] sm:$0xff]   ;;  %3553 = vmatpush3.bf16.msra.mxu0 %v3979_v3  ;;  %v3984_v8 = vld [vmem:[%s4444_s29 + $0x88] sm:$0xff]   ;;  %v3988_v12 = vld [vmem:[%s4444_s29 + $0x90] sm:$0xff]   ;;  %v798_v40 = vunpack.c.0.s8 %v797_v38 }
  0x26   : > { %3575 = vmatpush3.bf16.msra.mxu1 %v3980_v4  ;;  %3554 = vmatprep.subr.bf16.mxu0 %v3981_v5  ;;  %v3989_v13 = vld [vmem:[%s4444_s29 + $0x58] sm:$0xff]   ;;  %v3993_v17 = vld [vmem:[%s4444_s29 + $0x60] sm:$0xff]   ;;  %v3997_v21 = vld [vmem:[%s4444_s29 + $0x68] sm:$0xff]  }
  0x27   : > { %3576 = vmatprep.subr.bf16.mxu1 %v3982_v6  ;;  %v3990_v14 = vld [vmem:[%s4444_s29 + $0xd8] sm:$0xff]   ;;  %v3994_v18 = vld [vmem:[%s4444_s29 + $0xe0] sm:$0xff]   ;;  %v3998_v22 = vld [vmem:[%s4444_s29 + $0xe8] sm:$0xff]   ;;  %v4485_v42 = vsub.s32 %v798_v40, %v800_v34 }
  0x28   : > { %v3991_v15 = vld [vmem:[%s4444_s29 + $0x18] sm:$0xff]   ;;  %v3995_v19 = vld [vmem:[%s4444_s29 + $0x20] sm:$0xff]   ;;  %v3999_v23 = vld [vmem:[%s4444_s29 + $0x28] sm:$0xff]  }
  0x29   : > { %3555 = vmatpush3.bf16.msra.mxu0 %v3983_v7  ;;  %v3992_v16 = vld [vmem:[%s4444_s29 + $0x98] sm:$0xff]   ;;  %v3996_v20 = vld [vmem:[%s4444_s29 + $0xa0] sm:$0xff]   ;;  %v4000_v24 = vld [vmem:[%s4444_s29 + $0xa8] sm:$0xff]  }
  0x2a   : > { %3577 = vmatpush3.bf16.msra.mxu1 %v3984_v8  ;;  %3556 = vmatprep.subr.bf16.mxu0 %v3985_v9  ;;  %v4001_v25 = vld [vmem:[%s4444_s29 + $0x70] sm:$0xff]   ;;  %v4005_v30 = vld [vmem:[%s4444_s29 + $0x78] sm:$0xff]   ;;  %v267_v35 = vld [vmem:[%s4439_s20] sm:$0xff] }
  0x2b   : > { %3578 = vmatprep.subr.bf16.mxu1 %v3986_v10  ;;  %v4002_v26 = vld [vmem:[%s4444_s29 + $0xf0] sm:$0xff]   ;;  %v4006_v31 = vld [vmem:[%s4444_s29 + $0xf8] sm:$0xff]   ;;  %v4010_v36 = vld [vmem:[%s4444_s29 + $0x140] sm:$0xff]   ;;  %v795_v41 = vcombine.high %v267_v35, %v267_v35  ;;  %v802_v43 = vrot.slane %v267_v35, %v4485_v42 }
  0x2c   : > { %v4003_v27 = vld [vmem:[%s4444_s29 + $0x30] sm:$0xff]   ;;  %v4007_v32 = vld [vmem:[%s4444_s29 + $0x38] sm:$0xff]   ;;  %v4011_v39 = vld [vmem:[%s4444_s29 + $0x1c0] sm:$0xff]  }
  0x2d   : > { %3557 = vmatpush3.bf16.msra.mxu0 %v3987_v11  ;;  %v4004_v28 = vld [vmem:[%s4444_s29 + $0xb0] sm:$0xff]   ;;  %v4008_v33 = vld [vmem:[%s4444_s29 + $0xb8] sm:$0xff]   ;;  %v809_v44 = vrot.slane %v795_v41, %v4485_v42  ;;  %v4012_v45 = vld [vmem:[%s4444_s29 + $0x100] sm:$0xff]   ;;  %v810_v47 = vcombine.high %v802_v43, %v802_v43 }
  0x2e   : > { %3579 = vmatpush3.bf16.msra.mxu1 %v3988_v12  ;;  %3558 = vmatprep.subr.bf16.mxu0 %v3989_v13  ;;  %v4013_v46 = vld [vmem:[%s4444_s29 + $0x180] sm:$0xff]   ;;  %v4014_v49 = vld [vmem:[%s4444_s29 + $0x148] sm:$0xff]   ;;  %v4018_v53 = vld [vmem:[%s4444_s29 + $0x150] sm:$0xff]  }
  0x2f   : > { %3580 = vmatprep.subr.bf16.mxu1 %v3990_v14  ;;  %v811_v48 = vcombine.high %v809_v44, %v809_v44  ;;  %v4015_v50 = vld [vmem:[%s4444_s29 + $0x1c8] sm:$0xff]   ;;  %2531 = vmatprep.mubr.bf16.mxu0 %v810_v47  ;;  %v4019_v54 = vld [vmem:[%s4444_s29 + $0x1d0] sm:$0xff]   ;;  %v4022_v57 = vld [vmem:[%s4444_s29 + $0x158] sm:$0xff]  }
  0x30   : > { %v4016_v51 = vld [vmem:[%s4444_s29 + $0x108] sm:$0xff]   ;;  %v4020_v55 = vld [vmem:[%s4444_s29 + $0x110] sm:$0xff]   ;;  %v4023_v58 = vld [vmem:[%s4444_s29 + $0x1d8] sm:$0xff]  }
  0x31   : > { %3559 = vmatpush3.bf16.msra.mxu0 %v3991_v15  ;;  %2571 = vmatprep.mubr.bf16.mxu1 %v811_v48  ;;  %v4017_v52 = vld [vmem:[%s4444_s29 + $0x188] sm:$0xff]   ;;  %v4021_v56 = vld [vmem:[%s4444_s29 + $0x190] sm:$0xff]   ;;  %v4024_v59 = vld [vmem:[%s4444_s29 + $0x118] sm:$0xff]  }
  0x32   : > { %3581 = vmatpush3.bf16.msra.mxu1 %v3992_v16  ;;  %3560 = vmatprep.subr.bf16.mxu0 %v3993_v17  ;;  %v4025_v60 = vld [vmem:[%s4444_s29 + $0x198] sm:$0xff]   ;;  %v4026_v61 = vld [vmem:[%s4444_s29 + $0x160] sm:$0xff]   ;;  %v4030_v1 = vld [vmem:[%s4444_s29 + $0x168] sm:$0xff]  }
  0x33   : > { %3582 = vmatprep.subr.bf16.mxu1 %v3994_v18  ;;  %v4027_v62 = vld [vmem:[%s4444_s29 + $0x1e0] sm:$0xff]   ;;  %v4031_v2 = vld [vmem:[%s4444_s29 + $0x1e8] sm:$0xff]   ;;  %v4034_v5 = vld [vmem:[%s4444_s29 + $0x170] sm:$0xff]  }
  0x34   : > { %v4028_v63 = vld [vmem:[%s4444_s29 + $0x120] sm:$0xff]   ;;  %v4032_v3 = vld [vmem:[%s4444_s29 + $0x128] sm:$0xff]   ;;  %v4035_v6 = vld [vmem:[%s4444_s29 + $0x1f0] sm:$0xff]  }
  0x35   : > { %3561 = vmatpush3.bf16.msra.mxu0 %v3995_v19  ;;  %v4029_v0 = vld [vmem:[%s4444_s29 + $0x1a0] sm:$0xff]   ;;  %v4033_v4 = vld [vmem:[%s4444_s29 + $0x1a8] sm:$0xff]   ;;  %v4036_v7 = vld [vmem:[%s4444_s29 + $0x130] sm:$0xff]  }
  0x36   : > { %3583 = vmatpush3.bf16.msra.mxu1 %v3996_v20  ;;  %3562 = vmatprep.subr.bf16.mxu0 %v3997_v21  ;;  %v4037_v8 = vld [vmem:[%s4444_s29 + $0x1b0] sm:$0xff]   ;;  %v268_v9 = vld [vmem:[%s4439_s20 + $0x8] sm:$0xff]  ;;  %v4038_v10 = vld [vmem:[%s4444_s29 + $0x178] sm:$0xff]  }
  0x37   : > { %3584 = vmatprep.subr.bf16.mxu1 %v3998_v22  ;;  %v819_v11 = vrot.slane %v268_v9, %v4485_v42  ;;  %v812_v12 = vcombine.high %v268_v9, %v268_v9  ;;  %v4039_v13 = vld [vmem:[%s4444_s29 + $0x1f8] sm:$0xff]   ;;  %v4043_v19 = vld [vmem:[%s4444_s29 + $0x240] sm:$0xff]   ;;  %v4053_v29 = vld [vmem:[%s4444_s29 + $0x210] sm:$0xff]  }
  0x38   : > { %v4040_v14 = vld [vmem:[%s4444_s29 + $0x138] sm:$0xff]   ;;  %v4044_v20 = vld [vmem:[%s4444_s29 + $0x2c0] sm:$0xff]   ;;  %v4064_v40 = vld [vmem:[%s4444_s29 + $0x2e8] sm:$0xff]  }
  0x39   : > { %3563 = vmatpush3.bf16.msra.mxu0 %v3999_v23  ;;  %v827_v15 = vcombine.high %v819_v11, %v819_v11  ;;  %v826_v16 = vrot.slane %v812_v12, %v4485_v42  ;;  %v4041_v17 = vld [vmem:[%s4444_s29 + $0x1b8] sm:$0xff]   ;;  %v4045_v21 = vld [vmem:[%s4444_s29 + $0x200] sm:$0xff]   ;;  %v4047_v23 = vld [vmem:[%s4444_s29 + $0x248] sm:$0xff]  }
  0x3a   : > { %3585 = vmatpush3.bf16.msra.mxu1 %v4000_v24  ;;  %3564 = vmatprep.subr.bf16.mxu0 %v4001_v25  ;;  %v4046_v22 = vld [vmem:[%s4444_s29 + $0x280] sm:$0xff]   ;;  %v4048_v24 = vld [vmem:[%s4444_s29 + $0x2c8] sm:$0xff]   ;;  %v4058_v34 = vld [vmem:[%s4444_s29 + $0x298] sm:$0xff]  }
  0x3b   : > { %3586 = vmatprep.subr.bf16.mxu1 %v4002_v26  ;;  %v828_v18 = vcombine.high %v826_v16, %v826_v16  ;;  %v4049_v25 = vld [vmem:[%s4444_s29 + $0x208] sm:$0xff]   ;;  %v4059_v35 = vld [vmem:[%s4444_s29 + $0x260] sm:$0xff]   ;;  %v4070_v47 = vld [vmem:[%s4444_s29 + $0x2b0] sm:$0xff]  }
  0x3c   : > { %v4050_v26 = vld [vmem:[%s4444_s29 + $0x288] sm:$0xff]   ;;  %v4061_v37 = vld [vmem:[%s4444_s29 + $0x220] sm:$0xff]   ;;  %v269_v48 = vld [vmem:[%s4439_s20 + $0x10] sm:$0xff] }
  0x3d   : > { %3565 = vmatpush3.bf16.msra.mxu0 %v4003_v27  ;;  %v4051_v27 = vld [vmem:[%s4444_s29 + $0x250] sm:$0xff]   ;;  %v4062_v38 = vld [vmem:[%s4444_s29 + $0x2a0] sm:$0xff]   ;;  %v4065_v41 = vld [vmem:[%s4444_s29 + $0x228] sm:$0xff]  }
  0x3e   : > { %3587 = vmatpush3.bf16.msra.mxu1 %v4004_v28  ;;  %3566 = vmatprep.subr.bf16.mxu0 %v4005_v30  ;;  %v4052_v28 = vld [vmem:[%s4444_s29 + $0x2d0] sm:$0xff]   ;;  %v4091_v9 = vld [vmem:[%s4444_s29 + $0x398] sm:$0xff]   ;;  %v4094_v12 = vld [vmem:[%s4444_s29 + $0x320] sm:$0xff]  }
  0x3f   : > { %3588 = vmatprep.subr.bf16.mxu1 %v4006_v31  ;;  %v4054_v30 = vld [vmem:[%s4444_s29 + $0x290] sm:$0xff]   ;;  %v4055_v31 = vld [vmem:[%s4444_s29 + $0x258] sm:$0xff]  }
  0x41   : > { %3567 = vmatpush3.bf16.msra.mxu0 %v4007_v32  ;;  %v4056_v32 = vld [vmem:[%s4444_s29 + $0x2d8] sm:$0xff]  }
  0x42   : > { %3589 = vmatpush3.bf16.msra.mxu1 %v4008_v33  ;;  %3596 = vmatprep.subr.bf16.mxu0 %v4010_v36  ;;  %v4057_v33 = vld [vmem:[%s4444_s29 + $0x218] sm:$0xff]   ;;  %v4060_v36 = vld [vmem:[%s4444_s29 + $0x2e0] sm:$0xff]  }
  0x43   : > { %3618 = vmatprep.subr.bf16.mxu1 %v4011_v39  ;;  %v4063_v39 = vld [vmem:[%s4444_s29 + $0x268] sm:$0xff]  }
  0x44   : > { %2532 = vmatmul.mubr.bf16.vlgmr.msra.gmra.mrb[0].mxu0 %v802_v43  ;;  %v4066_v43 = vld [vmem:[%s4444_s29 + $0x2a8] sm:$0xff]  }
  0x45   : > { %2572 = vmatmul.mubr.bf16.vlgmr.msra.gmra.mrb[0].mxu1 %v809_v44  ;;  %3597 = vmatpush3.bf16.msra.mxu0 %v4012_v45  ;;  %v4067_v44 = vld [vmem:[%s4444_s29 + $0x270] sm:$0xff]  }
  0x46   : > { %3619 = vmatpush3.bf16.msra.mxu1 %v4013_v46  ;;  %3598 = vmatprep.subr.bf16.mxu0 %v4014_v49  ;;  %v4068_v45 = vld [vmem:[%s4444_s29 + $0x2f0] sm:$0xff]   ;;  %v4071_v49 = vld [vmem:[%s4444_s29 + $0x278] sm:$0xff]  }
  0x47   : > { %3620 = vmatprep.subr.bf16.mxu1 %v4015_v50  ;;  %2611 = vmatprep.mubr.bf16.mxu0 %v827_v15  ;;  %v4069_v46 = vld [vmem:[%s4444_s29 + $0x230] sm:$0xff]   ;;  %v836_v50 = vrot.slane %v269_v48, %v4485_v42  ;;  %v4097_v15 = vld [vmem:[%s4444_s29 + $0x3e8] sm:$0xff]  }
  0x48   : > { %2651 = vmatprep.mubr.bf16.mxu1 %v828_v18  ;;  %v4100_v18 = vld [vmem:[%s4444_s29 + $0x370] sm:$0xff]  }
  0x49   : > { %3599 = vmatpush3.bf16.msra.mxu0 %v4016_v51  ;;  %v829_v51 = vcombine.high %v269_v48, %v269_v48  ;;  %v4124_v48 = vld [vmem:[%s4444_s29 + $0x498] sm:$0xff]  }
  0x4a   : > { %3621 = vmatpush3.bf16.msra.mxu1 %v4017_v52  ;;  %3600 = vmatprep.subr.bf16.mxu0 %v4018_v53  ;;  %v4072_v52 = vld [vmem:[%s4444_s29 + $0x2f8] sm:$0xff]  }
  0x4b   : > { %3622 = vmatprep.subr.bf16.mxu1 %v4019_v54  ;;  %v4073_v53 = vld [vmem:[%s4444_s29 + $0x238] sm:$0xff]   ;;  %v844_v54 = vcombine.high %v836_v50, %v836_v50 }
  0x4d   : > { %3601 = vmatpush3.bf16.msra.mxu0 %v4020_v55  ;;  %v843_v55 = vrot.slane %v829_v51, %v4485_v42  ;;  %v4127_v51 = vld [vmem:[%s4444_s29 + $0x420] sm:$0xff]  }
  0x4e   : > { %3623 = vmatpush3.bf16.msra.mxu1 %v4021_v56  ;;  %3602 = vmatprep.subr.bf16.mxu0 %v4022_v57  ;;  %v4074_v56 = vld [vmem:[%s4444_s29 + $0x2b8] sm:$0xff]  }
  0x4f   : > { %3624 = vmatprep.subr.bf16.mxu1 %v4023_v58  ;;  %v845_v57 = vcombine.high %v843_v55, %v843_v55  ;;  %v4076_v58 = vld [vmem:[%s4444_s29 + $0x340] sm:$0xff]  }
  0x51   : > { %3603 = vmatpush3.bf16.msra.mxu0 %v4024_v59  ;;  %v4077_v59 = vld [vmem:[%s4444_s29 + $0x3c0] sm:$0xff]  }
  0x52   : > { %3625 = vmatpush3.bf16.msra.mxu1 %v4025_v60  ;;  %3604 = vmatprep.subr.bf16.mxu0 %v4026_v61  ;;  %v4078_v60 = vld [vmem:[%s4444_s29 + $0x300] sm:$0xff]  }
  0x53   : > { %3626 = vmatprep.subr.bf16.mxu1 %v4027_v62  ;;  %v4079_v61 = vld [vmem:[%s4444_s29 + $0x380] sm:$0xff]   ;;  %v4080_v62 = vld [vmem:[%s4444_s29 + $0x348] sm:$0xff]  }
  0x55   : > { %3605 = vmatpush3.bf16.msra.mxu0 %v4028_v63  ;;  %v4081_v63 = vld [vmem:[%s4444_s29 + $0x3c8] sm:$0xff]  }
  0x56   : > { %3627 = vmatpush3.bf16.msra.mxu1 %v4029_v0  ;;  %3606 = vmatprep.subr.bf16.mxu0 %v4030_v1  ;;  %v4082_v0 = vld [vmem:[%s4444_s29 + $0x308] sm:$0xff]  }
  0x57   : > { %3628 = vmatprep.subr.bf16.mxu1 %v4031_v2  ;;  %v4083_v1 = vld [vmem:[%s4444_s29 + $0x388] sm:$0xff]   ;;  %v4084_v2 = vld [vmem:[%s4444_s29 + $0x350] sm:$0xff]  }
  0x59   : > { %3607 = vmatpush3.bf16.msra.mxu0 %v4032_v3  ;;  %v4085_v3 = vld [vmem:[%s4444_s29 + $0x3d0] sm:$0xff]  }
  0x5a   : > { %3629 = vmatpush3.bf16.msra.mxu1 %v4033_v4  ;;  %3608 = vmatprep.subr.bf16.mxu0 %v4034_v5  ;;  %v4086_v4 = vld [vmem:[%s4444_s29 + $0x310] sm:$0xff]  }
  0x5b   : > { %3630 = vmatprep.subr.bf16.mxu1 %v4035_v6  ;;  %v4087_v5 = vld [vmem:[%s4444_s29 + $0x390] sm:$0xff]   ;;  %v4088_v6 = vld [vmem:[%s4444_s29 + $0x358] sm:$0xff]  }
  0x5d   : > { %3609 = vmatpush3.bf16.msra.mxu0 %v4036_v7  ;;  %v4089_v7 = vld [vmem:[%s4444_s29 + $0x3d8] sm:$0xff]  }
  0x5e   : > { %3631 = vmatpush3.bf16.msra.mxu1 %v4037_v8  ;;  %3610 = vmatprep.subr.bf16.mxu0 %v4038_v10  ;;  %v4090_v8 = vld [vmem:[%s4444_s29 + $0x318] sm:$0xff]   ;;  %v4092_v10 = vld [vmem:[%s4444_s29 + $0x360] sm:$0xff]  }
  0x5f   : > { %3632 = vmatprep.subr.bf16.mxu1 %v4039_v13  ;;  %v4095_v13 = vld [vmem:[%s4444_s29 + $0x3a0] sm:$0xff]  }
  0x61   : > { %3611 = vmatpush3.bf16.msra.mxu0 %v4040_v14  ;;  %v4096_v14 = vld [vmem:[%s4444_s29 + $0x368] sm:$0xff]  }
  0x62   : > { %3633 = vmatpush3.bf16.msra.mxu1 %v4041_v17  ;;  %3640 = vmatprep.subr.bf16.mxu0 %v4043_v19  ;;  %v4099_v17 = vld [vmem:[%s4444_s29 + $0x3a8] sm:$0xff]   ;;  %v4101_v19 = vld [vmem:[%s4444_s29 + $0x3f0] sm:$0xff]  }
  0x63   : > { %3662 = vmatprep.subr.bf16.mxu1 %v4044_v20  ;;  %v4102_v20 = vld [vmem:[%s4444_s29 + $0x330] sm:$0xff]  }
  0x64   : > { %2612 = vmatmul.mubr.bf16.vlgmr.msra.gmra.mrb[4].mxu0 %v819_v11  ;;  %v4093_v11 = vld [vmem:[%s4444_s29 + $0x3e0] sm:$0xff]  }
  0x65   : > { %2652 = vmatmul.mubr.bf16.vlgmr.msra.gmra.mrb[4].mxu1 %v826_v16  ;;  %3641 = vmatpush3.bf16.msra.mxu0 %v4045_v21  ;;  %v4098_v16 = vld [vmem:[%s4444_s29 + $0x328] sm:$0xff]   ;;  %v4103_v21 = vld [vmem:[%s4444_s29 + $0x3b0] sm:$0xff]  }
  0x66   : > { %3663 = vmatpush3.bf16.msra.mxu1 %v4046_v22  ;;  %3642 = vmatprep.subr.bf16.mxu0 %v4047_v23  ;;  %v4104_v22 = vld [vmem:[%s4444_s29 + $0x378] sm:$0xff]  }
  0x67   : > { %3664 = vmatprep.subr.bf16.mxu1 %v4048_v24  ;;  %2691 = vmatprep.mubr.bf16.mxu0 %v844_v54  ;;  %v270_v23 = vld [vmem:[%s4439_s20 + $0x18] sm:$0xff]  ;;  %v4130_v54 = vld [vmem:[%s4444_s29 + $0x4e8] sm:$0xff]  }
  0x68   : > { %2731 = vmatprep.mubr.bf16.mxu1 %v845_v57  ;;  %v4105_v24 = vld [vmem:[%s4444_s29 + $0x3f8] sm:$0xff]   ;;  %v4133_v57 = vld [vmem:[%s4444_s29 + $0x470] sm:$0xff]  }
  0x69   : > { %3643 = vmatpush3.bf16.msra.mxu0 %v4049_v25  ;;  %v853_v25 = vrot.slane %v270_v23, %v4485_v42 }
  0x6a   : > { %3665 = vmatpush3.bf16.msra.mxu1 %v4050_v26  ;;  %3644 = vmatprep.subr.bf16.mxu0 %v4051_v27  ;;  %v846_v26 = vcombine.high %v270_v23, %v270_v23  ;;  %v4106_v27 = vld [vmem:[%s4444_s29 + $0x338] sm:$0xff]   ;;  %v4158_v23 = vld [vmem:[%s4444_s29 + $0x560] sm:$0xff]  }
  0x6b   : > { %3666 = vmatprep.subr.bf16.mxu1 %v4052_v28  ;;  %v4107_v28 = vld [vmem:[%s4444_s29 + $0x3b8] sm:$0xff]  }
  0x6d   : > { %3645 = vmatpush3.bf16.msra.mxu0 %v4053_v29  ;;  %v861_v29 = vcombine.high %v853_v25, %v853_v25 }
  0x6e   : > { %3667 = vmatpush3.bf16.msra.mxu1 %v4054_v30  ;;  %3646 = vmatprep.subr.bf16.mxu0 %v4055_v31  ;;  %v860_v30 = vrot.slane %v846_v26, %v4485_v42  ;;  %v4109_v31 = vld [vmem:[%s4444_s29 + $0x440] sm:$0xff]  }
  0x6f   : > { %3668 = vmatprep.subr.bf16.mxu1 %v4056_v32  ;;  %v4161_v26 = vld [vmem:[%s4444_s29 + $0x5a0] sm:$0xff]  }
  0x70   : > { %v862_v32 = vcombine.high %v860_v30, %v860_v30 }
  0x71   : > { %3647 = vmatpush3.bf16.msra.mxu0 %v4057_v33  ;;  %v4110_v33 = vld [vmem:[%s4444_s29 + $0x4c0] sm:$0xff]  }
  0x72   : > { %3669 = vmatpush3.bf16.msra.mxu1 %v4058_v34  ;;  %3648 = vmatprep.subr.bf16.mxu0 %v4059_v35  ;;  %v4111_v34 = vld [vmem:[%s4444_s29 + $0x400] sm:$0xff]  }
  0x73   : > { %3670 = vmatprep.subr.bf16.mxu1 %v4060_v36  ;;  %v4112_v35 = vld [vmem:[%s4444_s29 + $0x480] sm:$0xff]   ;;  %v4113_v36 = vld [vmem:[%s4444_s29 + $0x448] sm:$0xff]  }
  0x75   : > { %3649 = vmatpush3.bf16.msra.mxu0 %v4061_v37  ;;  %v4114_v37 = vld [vmem:[%s4444_s29 + $0x4c8] sm:$0xff]  }
  0x76   : > { %3671 = vmatpush3.bf16.msra.mxu1 %v4062_v38  ;;  %3650 = vmatprep.subr.bf16.mxu0 %v4063_v39  ;;  %v4115_v38 = vld [vmem:[%s4444_s29 + $0x408] sm:$0xff]  }
  0x77   : > { %3672 = vmatprep.subr.bf16.mxu1 %v4064_v40  ;;  %v4116_v39 = vld [vmem:[%s4444_s29 + $0x488] sm:$0xff]   ;;  %v4117_v40 = vld [vmem:[%s4444_s29 + $0x450] sm:$0xff]  }
  0x79   : > { %3651 = vmatpush3.bf16.msra.mxu0 %v4065_v41  ;;  %v4118_v41 = vld [vmem:[%s4444_s29 + $0x4d0] sm:$0xff]  }
  0x7a   : > { %3673 = vmatpush3.bf16.msra.mxu1 %v4066_v43  ;;  %3652 = vmatprep.subr.bf16.mxu0 %v4067_v44  ;;  %v4119_v43 = vld [vmem:[%s4444_s29 + $0x410] sm:$0xff]  }
  0x7b   : > { %3674 = vmatprep.subr.bf16.mxu1 %v4068_v45  ;;  %v4120_v44 = vld [vmem:[%s4444_s29 + $0x490] sm:$0xff]   ;;  %v4121_v45 = vld [vmem:[%s4444_s29 + $0x458] sm:$0xff]  }
  0x7d   : > { %3653 = vmatpush3.bf16.msra.mxu0 %v4069_v46  ;;  %v4122_v46 = vld [vmem:[%s4444_s29 + $0x4d8] sm:$0xff]  }
  0x7e   : > { %3675 = vmatpush3.bf16.msra.mxu1 %v4070_v47  ;;  %3654 = vmatprep.subr.bf16.mxu0 %v4071_v49  ;;  %v4123_v47 = vld [vmem:[%s4444_s29 + $0x418] sm:$0xff]   ;;  %v4125_v49 = vld [vmem:[%s4444_s29 + $0x460] sm:$0xff]  }
  0x7f   : > { %3676 = vmatprep.subr.bf16.mxu1 %v4072_v52  ;;  %v4128_v52 = vld [vmem:[%s4444_s29 + $0x4a0] sm:$0xff]  }
  0x81   : > { %3655 = vmatpush3.bf16.msra.mxu0 %v4073_v53  ;;  %v4129_v53 = vld [vmem:[%s4444_s29 + $0x468] sm:$0xff]  }
  0x82   : > { %3677 = vmatpush3.bf16.msra.mxu1 %v4074_v56  ;;  %3684 = vmatprep.subr.bf16.mxu0 %v4076_v58  ;;  %v4132_v56 = vld [vmem:[%s4444_s29 + $0x4a8] sm:$0xff]   ;;  %v4134_v58 = vld [vmem:[%s4444_s29 + $0x4f0] sm:$0xff]  }
  0x83   : > { %3706 = vmatprep.subr.bf16.mxu1 %v4077_v59  ;;  %v4135_v59 = vld [vmem:[%s4444_s29 + $0x430] sm:$0xff]  }
  0x84   : > { %2692 = vmatmul.mubr.bf16.vlgmr.msra.gmra.mrb[8].mxu0 %v836_v50  ;;  %v4126_v50 = vld [vmem:[%s4444_s29 + $0x4e0] sm:$0xff]  }
  0x85   : > { %2732 = vmatmul.mubr.bf16.vlgmr.msra.gmra.mrb[8].mxu1 %v843_v55  ;;  %3685 = vmatpush3.bf16.msra.mxu0 %v4078_v60  ;;  %v4131_v55 = vld [vmem:[%s4444_s29 + $0x428] sm:$0xff]   ;;  %v4136_v60 = vld [vmem:[%s4444_s29 + $0x4b0] sm:$0xff]  }
  0x86   : > { %3707 = vmatpush3.bf16.msra.mxu1 %v4079_v61  ;;  %3686 = vmatprep.subr.bf16.mxu0 %v4080_v62  ;;  %v4137_v61 = vld [vmem:[%s4444_s29 + $0x478] sm:$0xff]   ;;  %v271_v62 = vld [vmem:[%s4439_s20 + $0x20] sm:$0xff] }
  0x87   : > { %3708 = vmatprep.subr.bf16.mxu1 %v4081_v63  ;;  %2771 = vmatprep.mubr.bf16.mxu0 %v861_v29  ;;  %v4138_v63 = vld [vmem:[%s4444_s29 + $0x4f8] sm:$0xff]   ;;  %v4164_v29 = vld [vmem:[%s4444_s29 + $0x528] sm:$0xff]  }
  0x88   : > { %2811 = vmatprep.mubr.bf16.mxu1 %v862_v32  ;;  %v4167_v32 = vld [vmem:[%s4444_s29 + $0x5f0] sm:$0xff]  }
  0x89   : > { %3687 = vmatpush3.bf16.msra.mxu0 %v4082_v0  ;;  %v870_v0 = vrot.slane %v271_v62, %v4485_v42 }
  0x8a   : > { %3709 = vmatpush3.bf16.msra.mxu1 %v4083_v1  ;;  %3688 = vmatprep.subr.bf16.mxu0 %v4084_v2  ;;  %v863_v1 = vcombine.high %v271_v62, %v271_v62  ;;  %v4139_v2 = vld [vmem:[%s4444_s29 + $0x438] sm:$0xff]   ;;  %v4191_v62 = vld [vmem:[%s4444_s29 + $0x660] sm:$0xff]  }
  0x8b   : > { %3710 = vmatprep.subr.bf16.mxu1 %v4085_v3  ;;  %v4140_v3 = vld [vmem:[%s4444_s29 + $0x4b8] sm:$0xff]  }
  0x8d   : > { %3689 = vmatpush3.bf16.msra.mxu0 %v4086_v4  ;;  %v878_v4 = vcombine.high %v870_v0, %v870_v0 }
  0x8e   : > { %3711 = vmatpush3.bf16.msra.mxu1 %v4087_v5  ;;  %3690 = vmatprep.subr.bf16.mxu0 %v4088_v6  ;;  %v877_v5 = vrot.slane %v863_v1, %v4485_v42  ;;  %v4142_v6 = vld [vmem:[%s4444_s29 + $0x540] sm:$0xff]  }
  0x8f   : > { %3712 = vmatprep.subr.bf16.mxu1 %v4089_v7  ;;  %v4194_v1 = vld [vmem:[%s4444_s29 + $0x6a0] sm:$0xff]  }
  0x90   : > { %v879_v7 = vcombine.high %v877_v5, %v877_v5 }
  0x91   : > { %3691 = vmatpush3.bf16.msra.mxu0 %v4090_v8  ;;  %v4143_v8 = vld [vmem:[%s4444_s29 + $0x5c0] sm:$0xff]  }
  0x92   : > { %3713 = vmatpush3.bf16.msra.mxu1 %v4091_v9  ;;  %3692 = vmatprep.subr.bf16.mxu0 %v4092_v10  ;;  %v4144_v9 = vld [vmem:[%s4444_s29 + $0x500] sm:$0xff]  }
  0x93   : > { %3714 = vmatprep.subr.bf16.mxu1 %v4093_v11  ;;  %v4145_v10 = vld [vmem:[%s4444_s29 + $0x580] sm:$0xff]   ;;  %v4146_v11 = vld [vmem:[%s4444_s29 + $0x548] sm:$0xff]  }
  0x95   : > { %3693 = vmatpush3.bf16.msra.mxu0 %v4094_v12  ;;  %v4147_v12 = vld [vmem:[%s4444_s29 + $0x5c8] sm:$0xff]  }
  0x96   : > { %3715 = vmatpush3.bf16.msra.mxu1 %v4095_v13  ;;  %3694 = vmatprep.subr.bf16.mxu0 %v4096_v14  ;;  %v4148_v13 = vld [vmem:[%s4444_s29 + $0x508] sm:$0xff]  }
  0x97   : > { %3716 = vmatprep.subr.bf16.mxu1 %v4097_v15  ;;  %v4149_v14 = vld [vmem:[%s4444_s29 + $0x588] sm:$0xff]   ;;  %v4150_v15 = vld [vmem:[%s4444_s29 + $0x550] sm:$0xff]  }
  0x99   : > { %3695 = vmatpush3.bf16.msra.mxu0 %v4098_v16  ;;  %v4151_v16 = vld [vmem:[%s4444_s29 + $0x5d0] sm:$0xff]  }
  0x9a   : > { %3717 = vmatpush3.bf16.msra.mxu1 %v4099_v17  ;;  %3696 = vmatprep.subr.bf16.mxu0 %v4100_v18  ;;  %v4152_v17 = vld [vmem:[%s4444_s29 + $0x510] sm:$0xff]  }
  0x9b   : > { %3718 = vmatprep.subr.bf16.mxu1 %v4101_v19  ;;  %v4153_v18 = vld [vmem:[%s4444_s29 + $0x590] sm:$0xff]   ;;  %v4154_v19 = vld [vmem:[%s4444_s29 + $0x558] sm:$0xff]  }
  0x9d   : > { %3697 = vmatpush3.bf16.msra.mxu0 %v4102_v20  ;;  %v4155_v20 = vld [vmem:[%s4444_s29 + $0x5d8] sm:$0xff]  }
  0x9e   : > { %3719 = vmatpush3.bf16.msra.mxu1 %v4103_v21  ;;  %3698 = vmatprep.subr.bf16.mxu0 %v4104_v22  ;;  %v4156_v21 = vld [vmem:[%s4444_s29 + $0x518] sm:$0xff]  }
  0x9f   : > { %3720 = vmatprep.subr.bf16.mxu1 %v4105_v24  ;;  %v4157_v22 = vld [vmem:[%s4444_s29 + $0x598] sm:$0xff]   ;;  %v4159_v24 = vld [vmem:[%s4444_s29 + $0x5e0] sm:$0xff]  }
  0xa1   : > { %3699 = vmatpush3.bf16.msra.mxu0 %v4106_v27  ;;  %v4162_v27 = vld [vmem:[%s4444_s29 + $0x568] sm:$0xff]  }
  0xa2   : > { %3721 = vmatpush3.bf16.msra.mxu1 %v4107_v28  ;;  %3728 = vmatprep.subr.bf16.mxu0 %v4109_v31  ;;  %v4163_v28 = vld [vmem:[%s4444_s29 + $0x5e8] sm:$0xff]   ;;  %v4166_v31 = vld [vmem:[%s4444_s29 + $0x570] sm:$0xff]  }
  0xa3   : > { %3750 = vmatprep.subr.bf16.mxu1 %v4110_v33  ;;  %v4168_v33 = vld [vmem:[%s4444_s29 + $0x530] sm:$0xff]  }
  0xa4   : > { %2772 = vmatmul.mubr.bf16.vlgmr.msra.gmra.mrb[12].mxu0 %v853_v25  ;;  %v4160_v25 = vld [vmem:[%s4444_s29 + $0x520] sm:$0xff]  }
  0xa5   : > { %2812 = vmatmul.mubr.bf16.vlgmr.msra.gmra.mrb[12].mxu1 %v860_v30  ;;  %3729 = vmatpush3.bf16.msra.mxu0 %v4111_v34  ;;  %v4165_v30 = vld [vmem:[%s4444_s29 + $0x5a8] sm:$0xff]   ;;  %v4169_v34 = vld [vmem:[%s4444_s29 + $0x5b0] sm:$0xff]  }
  0xa6   : > { %3751 = vmatpush3.bf16.msra.mxu1 %v4112_v35  ;;  %3730 = vmatprep.subr.bf16.mxu0 %v4113_v36  ;;  %v4170_v35 = vld [vmem:[%s4444_s29 + $0x578] sm:$0xff]   ;;  %v272_v36 = vld [vmem:[%s4439_s20 + $0x28] sm:$0xff] }
  0xa7   : > { %3752 = vmatprep.subr.bf16.mxu1 %v4114_v37  ;;  %2851 = vmatprep.mubr.bf16.mxu0 %v878_v4  ;;  %v4171_v37 = vld [vmem:[%s4444_s29 + $0x5f8] sm:$0xff]   ;;  %v4197_v4 = vld [vmem:[%s4444_s29 + $0x628] sm:$0xff]  }
  0xa8   : > { %2891 = vmatprep.mubr.bf16.mxu1 %v879_v7  ;;  %v4200_v7 = vld [vmem:[%s4444_s29 + $0x6f0] sm:$0xff]  }
  0xa9   : > { %3731 = vmatpush3.bf16.msra.mxu0 %v4115_v38  ;;  %v887_v38 = vrot.slane %v272_v36, %v4485_v42 }
  0xaa   : > { %3753 = vmatpush3.bf16.msra.mxu1 %v4116_v39  ;;  %3732 = vmatprep.subr.bf16.mxu0 %v4117_v40  ;;  %v880_v39 = vcombine.high %v272_v36, %v272_v36  ;;  %v4172_v40 = vld [vmem:[%s4444_s29 + $0x538] sm:$0xff]   ;;  %v4224_v36 = vld [vmem:[%s4444_s29 + $0x760] sm:$0xff]  }
  0xab   : > { %3754 = vmatprep.subr.bf16.mxu1 %v4118_v41  ;;  %v4173_v41 = vld [vmem:[%s4444_s29 + $0x5b8] sm:$0xff]  }
  0xad   : > { %3733 = vmatpush3.bf16.msra.mxu0 %v4119_v43  ;;  %v895_v43 = vcombine.high %v887_v38, %v887_v38 }
  0xae   : > { %3755 = vmatpush3.bf16.msra.mxu1 %v4120_v44  ;;  %3734 = vmatprep.subr.bf16.mxu0 %v4121_v45  ;;  %v894_v44 = vrot.slane %v880_v39, %v4485_v42  ;;  %v4175_v45 = vld [vmem:[%s4444_s29 + $0x640] sm:$0xff]  }
  0xaf   : > { %3756 = vmatprep.subr.bf16.mxu1 %v4122_v46  ;;  %v4227_v39 = vld [vmem:[%s4444_s29 + $0x7a0] sm:$0xff]  }
  0xb0   : > { %v896_v46 = vcombine.high %v894_v44, %v894_v44 }
  0xb1   : > { %3735 = vmatpush3.bf16.msra.mxu0 %v4123_v47  ;;  %v4176_v47 = vld [vmem:[%s4444_s29 + $0x6c0] sm:$0xff]  }
  0xb2   : > { %3757 = vmatpush3.bf16.msra.mxu1 %v4124_v48  ;;  %3736 = vmatprep.subr.bf16.mxu0 %v4125_v49  ;;  %v4177_v48 = vld [vmem:[%s4444_s29 + $0x600] sm:$0xff]  }
  0xb3   : > { %3758 = vmatprep.subr.bf16.mxu1 %v4126_v50  ;;  %v4178_v49 = vld [vmem:[%s4444_s29 + $0x680] sm:$0xff]   ;;  %v4179_v50 = vld [vmem:[%s4444_s29 + $0x648] sm:$0xff]  }
  0xb5   : > { %3737 = vmatpush3.bf16.msra.mxu0 %v4127_v51  ;;  %v4180_v51 = vld [vmem:[%s4444_s29 + $0x6c8] sm:$0xff]  }
  0xb6   : > { %3759 = vmatpush3.bf16.msra.mxu1 %v4128_v52  ;;  %3738 = vmatprep.subr.bf16.mxu0 %v4129_v53  ;;  %v4181_v52 = vld [vmem:[%s4444_s29 + $0x608] sm:$0xff]  }
  0xb7   : > { %3760 = vmatprep.subr.bf16.mxu1 %v4130_v54  ;;  %v4182_v53 = vld [vmem:[%s4444_s29 + $0x688] sm:$0xff]   ;;  %v4183_v54 = vld [vmem:[%s4444_s29 + $0x650] sm:$0xff]  }
  0xb9   : > { %3739 = vmatpush3.bf16.msra.mxu0 %v4131_v55  ;;  %v4184_v55 = vld [vmem:[%s4444_s29 + $0x6d0] sm:$0xff]  }
  0xba   : > { %3761 = vmatpush3.bf16.msra.mxu1 %v4132_v56  ;;  %3740 = vmatprep.subr.bf16.mxu0 %v4133_v57  ;;  %v4185_v56 = vld [vmem:[%s4444_s29 + $0x610] sm:$0xff]  }
  0xbb   : > { %3762 = vmatprep.subr.bf16.mxu1 %v4134_v58  ;;  %v4186_v57 = vld [vmem:[%s4444_s29 + $0x690] sm:$0xff]   ;;  %v4187_v58 = vld [vmem:[%s4444_s29 + $0x658] sm:$0xff]  }
  0xbd   : > { %3741 = vmatpush3.bf16.msra.mxu0 %v4135_v59  ;;  %v4188_v59 = vld [vmem:[%s4444_s29 + $0x6d8] sm:$0xff]  }
  0xbe   : > { %3763 = vmatpush3.bf16.msra.mxu1 %v4136_v60  ;;  %3742 = vmatprep.subr.bf16.mxu0 %v4137_v61  ;;  %v4189_v60 = vld [vmem:[%s4444_s29 + $0x618] sm:$0xff]  }
  0xbf   : > { %3764 = vmatprep.subr.bf16.mxu1 %v4138_v63  ;;  %v4190_v61 = vld [vmem:[%s4444_s29 + $0x698] sm:$0xff]   ;;  %v4192_v63 = vld [vmem:[%s4444_s29 + $0x6e0] sm:$0xff]  }
  0xc1   : > { %3743 = vmatpush3.bf16.msra.mxu0 %v4139_v2  ;;  %v4195_v2 = vld [vmem:[%s4444_s29 + $0x668] sm:$0xff]  }
  0xc2   : > { %3765 = vmatpush3.bf16.msra.mxu1 %v4140_v3  ;;  %3772 = vmatprep.subr.bf16.mxu0 %v4142_v6  ;;  %v4196_v3 = vld [vmem:[%s4444_s29 + $0x6e8] sm:$0xff]   ;;  %v4199_v6 = vld [vmem:[%s4444_s29 + $0x670] sm:$0xff]  }
  0xc3   : > { %3794 = vmatprep.subr.bf16.mxu1 %v4143_v8  ;;  %v4201_v8 = vld [vmem:[%s4444_s29 + $0x630] sm:$0xff]  }
  0xc4   : > { %2852 = vmatmul.mubr.bf16.vlgmr.msra.gmra.mrb[16].mxu0 %v870_v0  ;;  %v4193_v0 = vld [vmem:[%s4444_s29 + $0x620] sm:$0xff]  }
  0xc5   : > { %2892 = vmatmul.mubr.bf16.vlgmr.msra.gmra.mrb[16].mxu1 %v877_v5  ;;  %3773 = vmatpush3.bf16.msra.mxu0 %v4144_v9  ;;  %v4198_v5 = vld [vmem:[%s4444_s29 + $0x6a8] sm:$0xff]   ;;  %v4202_v9 = vld [vmem:[%s4444_s29 + $0x6b0] sm:$0xff]  }
  0xc6   : > { %3795 = vmatpush3.bf16.msra.mxu1 %v4145_v10  ;;  %3774 = vmatprep.subr.bf16.mxu0 %v4146_v11  ;;  %v4203_v10 = vld [vmem:[%s4444_s29 + $0x678] sm:$0xff]  }
  0xc7   : > { %3796 = vmatprep.subr.bf16.mxu1 %v4147_v12  ;;  %2931 = vmatprep.mubr.bf16.mxu0 %v895_v43  ;;  %v4204_v11 = vld [vmem:[%s4444_s29 + $0x6f8] sm:$0xff]   ;;  %v273_v12 = vld [vmem:[%s4439_s20 + $0x30] sm:$0xff]  ;;  %v4230_v43 = vld [vmem:[%s4444_s29 + $0x728] sm:$0xff]  }
  0xc8   : > { %2971 = vmatprep.mubr.bf16.mxu1 %v896_v46  ;;  %v4233_v46 = vld [vmem:[%s4444_s29 + $0x7f0] sm:$0xff]  }
  0xc9   : > { %3775 = vmatpush3.bf16.msra.mxu0 %v4148_v13  ;;  %v4205_v13 = vld [vmem:[%s4444_s29 + $0x638] sm:$0xff]  }
  0xca   : > { %3797 = vmatpush3.bf16.msra.mxu1 %v4149_v14  ;;  %3776 = vmatprep.subr.bf16.mxu0 %v4150_v15  ;;  %v904_v14 = vrot.slane %v273_v12, %v4485_v42  ;;  %v897_v15 = vcombine.high %v273_v12, %v273_v12 }
  0xcb   : > { %3798 = vmatprep.subr.bf16.mxu1 %v4151_v16  ;;  %v4206_v16 = vld [vmem:[%s4444_s29 + $0x6b8] sm:$0xff]  }
  0xcd   : > { %3777 = vmatpush3.bf16.msra.mxu0 %v4152_v17  ;;  %v912_v17 = vcombine.high %v904_v14, %v904_v14 }
  0xce   : > { %3799 = vmatpush3.bf16.msra.mxu1 %v4153_v18  ;;  %3778 = vmatprep.subr.bf16.mxu0 %v4154_v19  ;;  %v911_v18 = vrot.slane %v897_v15, %v4485_v42  ;;  %v4208_v19 = vld [vmem:[%s4444_s29 + $0x740] sm:$0xff]  }
  0xcf   : > { %3800 = vmatprep.subr.bf16.mxu1 %v4155_v20  ;;  %v4209_v20 = vld [vmem:[%s4444_s29 + $0x7c0] sm:$0xff]  }
  0xd1   : > { %3779 = vmatpush3.bf16.msra.mxu0 %v4156_v21  ;;  %v913_v21 = vcombine.high %v911_v18, %v911_v18 }
  0xd2   : > { %3801 = vmatpush3.bf16.msra.mxu1 %v4157_v22  ;;  %3780 = vmatprep.subr.bf16.mxu0 %v4158_v23  ;;  %v4210_v22 = vld [vmem:[%s4444_s29 + $0x700] sm:$0xff]  }
  0xd3   : > { %3802 = vmatprep.subr.bf16.mxu1 %v4159_v24  ;;  %v4211_v23 = vld [vmem:[%s4444_s29 + $0x780] sm:$0xff]   ;;  %v4212_v24 = vld [vmem:[%s4444_s29 + $0x748] sm:$0xff]  }
  0xd5   : > { %3781 = vmatpush3.bf16.msra.mxu0 %v4160_v25  ;;  %v4213_v25 = vld [vmem:[%s4444_s29 + $0x7c8] sm:$0xff]  }
  0xd6   : > { %3803 = vmatpush3.bf16.msra.mxu1 %v4161_v26  ;;  %3782 = vmatprep.subr.bf16.mxu0 %v4162_v27  ;;  %v4214_v26 = vld [vmem:[%s4444_s29 + $0x708] sm:$0xff]  }
  0xd7   : > { %3804 = vmatprep.subr.bf16.mxu1 %v4163_v28  ;;  %v4215_v27 = vld [vmem:[%s4444_s29 + $0x788] sm:$0xff]   ;;  %v4216_v28 = vld [vmem:[%s4444_s29 + $0x750] sm:$0xff]  }
  0xd9   : > { %3783 = vmatpush3.bf16.msra.mxu0 %v4164_v29  ;;  %v4217_v29 = vld [vmem:[%s4444_s29 + $0x7d0] sm:$0xff]  }
  0xda   : > { %3805 = vmatpush3.bf16.msra.mxu1 %v4165_v30  ;;  %3784 = vmatprep.subr.bf16.mxu0 %v4166_v31  ;;  %v4218_v30 = vld [vmem:[%s4444_s29 + $0x710] sm:$0xff]  }
  0xdb   : > { %3806 = vmatprep.subr.bf16.mxu1 %v4167_v32  ;;  %v4219_v31 = vld [vmem:[%s4444_s29 + $0x790] sm:$0xff]   ;;  %v4220_v32 = vld [vmem:[%s4444_s29 + $0x758] sm:$0xff]  }
  0xdd   : > { %3785 = vmatpush3.bf16.msra.mxu0 %v4168_v33  ;;  %v4221_v33 = vld [vmem:[%s4444_s29 + $0x7d8] sm:$0xff]  }
  0xde   : > { %3807 = vmatpush3.bf16.msra.mxu1 %v4169_v34  ;;  %3786 = vmatprep.subr.bf16.mxu0 %v4170_v35  ;;  %v4222_v34 = vld [vmem:[%s4444_s29 + $0x718] sm:$0xff]  }
  0xdf   : > { %3808 = vmatprep.subr.bf16.mxu1 %v4171_v37  ;;  %v4223_v35 = vld [vmem:[%s4444_s29 + $0x798] sm:$0xff]   ;;  %v4225_v37 = vld [vmem:[%s4444_s29 + $0x7e0] sm:$0xff]  }
  0xe1   : > { %3787 = vmatpush3.bf16.msra.mxu0 %v4172_v40  ;;  %v4228_v40 = vld [vmem:[%s4444_s29 + $0x768] sm:$0xff]  }
  0xe2   : > { %3809 = vmatpush3.bf16.msra.mxu1 %v4173_v41  ;;  %3816 = vmatprep.subr.bf16.mxu0 %v4175_v45  ;;  %v4229_v41 = vld [vmem:[%s4444_s29 + $0x7e8] sm:$0xff]   ;;  %v4232_v45 = vld [vmem:[%s4444_s29 + $0x770] sm:$0xff]  }
  0xe3   : > { %3838 = vmatprep.subr.bf16.mxu1 %v4176_v47 }
  0xe4   : > { %2932 = vmatmul.mubr.bf16.vlgmr.msra.gmra.mrb[20].mxu0 %v887_v38  ;;  %v4226_v38 = vld [vmem:[%s4444_s29 + $0x720] sm:$0xff]  }
  0xe5   : > { %2972 = vmatmul.mubr.bf16.vlgmr.msra.gmra.mrb[20].mxu1 %v894_v44  ;;  %3817 = vmatpush3.bf16.msra.mxu0 %v4177_v48  ;;  %v4231_v44 = vld [vmem:[%s4444_s29 + $0x7a8] sm:$0xff]  }
  0xe6   : > { %3839 = vmatpush3.bf16.msra.mxu1 %v4178_v49  ;;  %3818 = vmatprep.subr.bf16.mxu0 %v4179_v50  ;;  %v4234_v49 = vld [vmem:[%s4444_s29 + $0x730] sm:$0xff]  }
  0xe7   : > { %3840 = vmatprep.subr.bf16.mxu1 %v4180_v51  ;;  %3011 = vmatprep.mubr.bf16.mxu0 %v912_v17  ;;  %v4235_v50 = vld [vmem:[%s4444_s29 + $0x7b0] sm:$0xff]  }
  0xe8   : > { %3051 = vmatprep.mubr.bf16.mxu1 %v913_v21 }
  0xe9   : > { %3819 = vmatpush3.bf16.msra.mxu0 %v4181_v52 }
  0xea   : > { %3841 = vmatpush3.bf16.msra.mxu1 %v4182_v53  ;;  %3820 = vmatprep.subr.bf16.mxu0 %v4183_v54 }
  0xeb   : > { %3842 = vmatprep.subr.bf16.mxu1 %v4184_v55 }
  0xed   : > { %3821 = vmatpush3.bf16.msra.mxu0 %v4185_v56 }
  0xee   : > { %3843 = vmatpush3.bf16.msra.mxu1 %v4186_v57  ;;  %3822 = vmatprep.subr.bf16.mxu0 %v4187_v58  ;;  %v4236_v57 = vld [vmem:[%s4444_s29 + $0x778] sm:$0xff]  }
  0xef   : > { %3844 = vmatprep.subr.bf16.mxu1 %v4188_v59  ;;  %v4237_v58 = vld [vmem:[%s4444_s29 + $0x7f8] sm:$0xff]  }
  0xf1   : > { %3823 = vmatpush3.bf16.msra.mxu0 %v4189_v60 }
  0xf2   : > { %3845 = vmatpush3.bf16.msra.mxu1 %v4190_v61  ;;  %3824 = vmatprep.subr.bf16.mxu0 %v4191_v62  ;;  %v274_v62 = vld [vmem:[%s4439_s20 + $0x38] sm:$0xff] }
  0xf3   : > { %3846 = vmatprep.subr.bf16.mxu1 %v4192_v63  ;;  %v921_v63 = vrot.slane %v274_v62, %v4485_v42 }
  0xf5   : > { %3825 = vmatpush3.bf16.msra.mxu0 %v4193_v0  ;;  %v914_v0 = vcombine.high %v274_v62, %v274_v62 }
  0xf6   : > { %3847 = vmatpush3.bf16.msra.mxu1 %v4194_v1  ;;  %3826 = vmatprep.subr.bf16.mxu0 %v4195_v2  ;;  %v4238_v1 = vld [vmem:[%s4444_s29 + $0x738] sm:$0xff]  }
  0xf7   : > { %3848 = vmatprep.subr.bf16.mxu1 %v4196_v3  ;;  %v4239_v2 = vld [vmem:[%s4444_s29 + $0x7b8] sm:$0xff]   ;;  %v929_v3 = vcombine.high %v921_v63, %v921_v63 }
  0xf9   : > { %3827 = vmatpush3.bf16.msra.mxu0 %v4197_v4  ;;  %v928_v4 = vrot.slane %v914_v0, %v4485_v42 }
  0xfa   : > { %3849 = vmatpush3.bf16.msra.mxu1 %v4198_v5  ;;  %3828 = vmatprep.subr.bf16.mxu0 %v4199_v6 }
  0xfb   : > { %3850 = vmatprep.subr.bf16.mxu1 %v4200_v7  ;;  %v930_v5 = vcombine.high %v928_v4, %v928_v4 }
  0xfd   : > { %3829 = vmatpush3.bf16.msra.mxu0 %v4201_v8 }
  0xfe   : > { %3851 = vmatpush3.bf16.msra.mxu1 %v4202_v9  ;;  %3830 = vmatprep.subr.bf16.mxu0 %v4203_v10 }
  0xff   : > { %3852 = vmatprep.subr.bf16.mxu1 %v4204_v11 }
 0x101   : > { %3831 = vmatpush3.bf16.msra.mxu0 %v4205_v13 }
 0x102   : > { %3853 = vmatpush3.bf16.msra.mxu1 %v4206_v16  ;;  %3860 = vmatprep.subr.bf16.mxu0 %v4208_v19 }
 0x103   : > { %3882 = vmatprep.subr.bf16.mxu1 %v4209_v20 }
 0x104   : > { %3012 = vmatmul.mubr.bf16.vlgmr.msra.gmra.mrb[24].mxu0 %v904_v14 }
 0x105   : > { %3052 = vmatmul.mubr.bf16.vlgmr.msra.gmra.mrb[24].mxu1 %v911_v18  ;;  %3861 = vmatpush3.bf16.msra.mxu0 %v4210_v22 }
 0x106   : > { %3883 = vmatpush3.bf16.msra.mxu1 %v4211_v23  ;;  %3862 = vmatprep.subr.bf16.mxu0 %v4212_v24 }
 0x107   : > { %3884 = vmatprep.subr.bf16.mxu1 %v4213_v25  ;;  %3091 = vmatprep.mubr.bf16.mxu0 %v929_v3 }
 0x108   : > { %3131 = vmatprep.mubr.bf16.mxu1 %v930_v5 }
 0x109   : > { %3863 = vmatpush3.bf16.msra.mxu0 %v4214_v26 }
 0x10a   : > { %3885 = vmatpush3.bf16.msra.mxu1 %v4215_v27  ;;  %3864 = vmatprep.subr.bf16.mxu0 %v4216_v28 }
 0x10b   : > { %3886 = vmatprep.subr.bf16.mxu1 %v4217_v29 }
 0x10d   : > { %3865 = vmatpush3.bf16.msra.mxu0 %v4218_v30 }
 0x10e   : > { %3887 = vmatpush3.bf16.msra.mxu1 %v4219_v31  ;;  %3866 = vmatprep.subr.bf16.mxu0 %v4220_v32 }
 0x10f   : > { %3888 = vmatprep.subr.bf16.mxu1 %v4221_v33 }
 0x111   : > { %3867 = vmatpush3.bf16.msra.mxu0 %v4222_v34 }
 0x112   : > { %3889 = vmatpush3.bf16.msra.mxu1 %v4223_v35  ;;  %3868 = vmatprep.subr.bf16.mxu0 %v4224_v36 }
 0x113   : > { %3890 = vmatprep.subr.bf16.mxu1 %v4225_v37 }
 0x115   : > { %3869 = vmatpush3.bf16.msra.mxu0 %v4226_v38 }
 0x116   : > { %3891 = vmatpush3.bf16.msra.mxu1 %v4227_v39  ;;  %3870 = vmatprep.subr.bf16.mxu0 %v4228_v40 }
 0x117   : > { %3892 = vmatprep.subr.bf16.mxu1 %v4229_v41  ;;  %v3568_v47 = vpop.f32.mrb[0].mxu0 }
 0x118   : > { %v3590_v48 = vpop.f32.mrb[0].mxu1  ;;  %v3569_v51 = vpop.f32.mrb[1].mxu0 }
 0x119   : > { %v3591_v52 = vpop.f32.mrb[1].mxu1  ;;  %v3570_v53 = vadd.f32 %v3569_v51, %v3568_v47  ;;  %v3571_v55 = vpop.f32.mrb[2].mxu0  ;;  %3871 = vmatpush3.bf16.msra.mxu0 %v4230_v43 }
 0x11a   : > { %v3592_v54 = vadd.f32 %v3591_v52, %v3590_v48  ;;  %v3593_v56 = vpop.f32.mrb[2].mxu1  ;;  %3893 = vmatpush3.bf16.msra.mxu1 %v4231_v44  ;;  %v3572_v59 = vpop.f32.mrb[3].mxu0  ;;  %3872 = vmatprep.subr.bf16.mxu0 %v4232_v45 }
 0x11b   : > { %v3594_v60 = vpop.f32.mrb[3].mxu1  ;;  %3894 = vmatprep.subr.bf16.mxu1 %v4233_v46 }
 0x11c   : > { %v2574_v61 = vadd.f32 %v3592_v54, %v3570_v53 }
 0x11d   : > { %3873 = vmatpush3.bf16.msra.mxu0 %v4234_v49 }
 0x11e   : > { %3895 = vmatpush3.bf16.msra.mxu1 %v4235_v50  ;;  %3874 = vmatprep.subr.bf16.mxu0 %v4236_v57 }
 0x11f   : > { %3896 = vmatprep.subr.bf16.mxu1 %v4237_v58 }
 0x121   : > { %3875 = vmatpush3.bf16.msra.mxu0 %v4238_v1 }
 0x122   : > { %3897 = vmatpush3.bf16.msra.mxu1 %v4239_v2 }
 0x124   : > { %3092 = vmatmul.mubr.bf16.vlgmr.msra.gmra.mrb[28].mxu0 %v921_v63 }
 0x125   : > { %3132 = vmatmul.mubr.bf16.vlgmr.msra.gmra.mrb[28].mxu1 %v928_v4 }
 0x137   : > { %v3612_v6 = vpop.f32.mrb[4].mxu0 }
 0x138   : > { %v3634_v7 = vpop.f32.mrb[4].mxu1  ;;  %v3613_v8 = vpop.f32.mrb[5].mxu0 }
 0x139   : > { %v3635_v9 = vpop.f32.mrb[5].mxu1  ;;  %v3614_v10 = vadd.f32 %v3613_v8, %v3612_v6  ;;  %v3615_v12 = vpop.f32.mrb[6].mxu0 }
 0x13a   : > { %v3636_v11 = vadd.f32 %v3635_v9, %v3634_v7  ;;  %v3637_v13 = vpop.f32.mrb[6].mxu1  ;;  %v3616_v14 = vpop.f32.mrb[7].mxu0 }
 0x13b   : > { %v3638_v15 = vpop.f32.mrb[7].mxu1  ;;  %v2614_v16 = vadd.f32 %v3614_v10, %v2574_v61 }
 0x13d   : > { %v2654_v17 = vadd.f32 %v3636_v11, %v2614_v16 }
 0x157   : > { %v3656_v42 = vpop.f32.mrb[8].mxu0 }
 0x158   : > { %v3678_v18 = vpop.f32.mrb[8].mxu1  ;;  %v3657_v19 = vpop.f32.mrb[9].mxu0 }
 0x159   : > { %v3679_v20 = vpop.f32.mrb[9].mxu1  ;;  %v3658_v21 = vadd.f32 %v3657_v19, %v3656_v42  ;;  %v3659_v23 = vpop.f32.mrb[10].mxu0 }
 0x15a   : > { %v3680_v22 = vadd.f32 %v3679_v20, %v3678_v18  ;;  %v3681_v24 = vpop.f32.mrb[10].mxu1  ;;  %v3660_v25 = vpop.f32.mrb[11].mxu0 }
 0x15b   : > { %v3682_v26 = vpop.f32.mrb[11].mxu1  ;;  %v2694_v27 = vadd.f32 %v3658_v21, %v2654_v17  ;;  %v266_v24 = vld [vmem:[%s4446_s23] sm:$0xf] }
 0x15d   : > { %v2734_v28 = vadd.f32 %v3680_v22, %v2694_v27 }
 0x177   : > { %v3700_v29 = vpop.f32.mrb[12].mxu0 }
 0x178   : > { %v3722_v30 = vpop.f32.mrb[12].mxu1  ;;  %v3701_v31 = vpop.f32.mrb[13].mxu0 }
 0x179   : > { %v3723_v32 = vpop.f32.mrb[13].mxu1  ;;  %v3702_v33 = vadd.f32 %v3701_v31, %v3700_v29  ;;  %v3703_v35 = vpop.f32.mrb[14].mxu0 }
 0x17a   : > { %v3724_v34 = vadd.f32 %v3723_v32, %v3722_v30  ;;  %v3725_v36 = vpop.f32.mrb[14].mxu1  ;;  %v3704_v37 = vpop.f32.mrb[15].mxu0 }
 0x17b   : > { %v3726_v38 = vpop.f32.mrb[15].mxu1  ;;  %v2774_v39 = vadd.f32 %v3702_v33, %v2734_v28  ;;  %v3147_v28 = vld [vmem:[%s4796_s2] sm:$0xf] (!%p3547_p2) }
 0x17d   : > { %v2814_v40 = vadd.f32 %v3724_v34, %v2774_v39 }
 0x197   : > { %v3744_v41 = vpop.f32.mrb[16].mxu0 }
 0x198   : > { %v3766_v43 = vpop.f32.mrb[16].mxu1  ;;  %v3745_v44 = vpop.f32.mrb[17].mxu0 }
 0x199   : > { %v3767_v45 = vpop.f32.mrb[17].mxu1  ;;  %v3746_v46 = vadd.f32 %v3745_v44, %v3744_v41  ;;  %v3747_v48 = vpop.f32.mrb[18].mxu0 }
 0x19a   : > { %v3768_v47 = vadd.f32 %v3767_v45, %v3766_v43  ;;  %v3769_v49 = vpop.f32.mrb[18].mxu1  ;;  %v3748_v50 = vpop.f32.mrb[19].mxu0 }
 0x19b   : > { %v3770_v51 = vpop.f32.mrb[19].mxu1  ;;  %v2854_v52 = vadd.f32 %v3746_v46, %v2814_v40 }
 0x19d   : > { %v2894_v53 = vadd.f32 %v3768_v47, %v2854_v52 }
 0x1b7   : > { %v3788_v54 = vpop.f32.mrb[20].mxu0 }
 0x1b8   : > { %v3810_v55 = vpop.f32.mrb[20].mxu1  ;;  %v3789_v56 = vpop.f32.mrb[21].mxu0 }
 0x1b9   : > { %v3811_v57 = vpop.f32.mrb[21].mxu1  ;;  %v3790_v58 = vadd.f32 %v3789_v56, %v3788_v54  ;;  %v3791_v60 = vpop.f32.mrb[22].mxu0 }
 0x1ba   : > { %v3812_v59 = vadd.f32 %v3811_v57, %v3810_v55  ;;  %v3813_v61 = vpop.f32.mrb[22].mxu1  ;;  %v3792_v62 = vpop.f32.mrb[23].mxu0 }
 0x1bb   : > { %v3814_v63 = vpop.f32.mrb[23].mxu1  ;;  %v2934_v0 = vadd.f32 %v3790_v58, %v2894_v53 }
 0x1bd   : > { %v2974_v1 = vadd.f32 %v3812_v59, %v2934_v0 }
 0x1d7   : > { %v3832_v2 = vpop.f32.mrb[24].mxu0 }
 0x1d8   : > { %v3854_v3 = vpop.f32.mrb[24].mxu1  ;;  %v3833_v4 = vpop.f32.mrb[25].mxu0 }
 0x1d9   : > { %v3855_v5 = vpop.f32.mrb[25].mxu1  ;;  %v3834_v6 = vadd.f32 %v3833_v4, %v3832_v2  ;;  %v3835_v8 = vpop.f32.mrb[26].mxu0 }
 0x1da   : > { %v3856_v7 = vadd.f32 %v3855_v5, %v3854_v3  ;;  %v3857_v9 = vpop.f32.mrb[26].mxu1  ;;  %v3836_v10 = vpop.f32.mrb[27].mxu0 }
 0x1db   : > { %v3858_v11 = vpop.f32.mrb[27].mxu1  ;;  %v3014_v12 = vadd.f32 %v3834_v6, %v2974_v1 }
 0x1dd   : > { %v3054_v13 = vadd.f32 %v3856_v7, %v3014_v12 }
 0x1f7   : > { %v3876_v14 = vpop.f32.mrb[28].mxu0 }
 0x1f8   : > { %v3898_v15 = vpop.f32.mrb[28].mxu1  ;;  %v3877_v16 = vpop.f32.mrb[29].mxu0 }
 0x1f9   : > { %v3899_v17 = vpop.f32.mrb[29].mxu1  ;;  %v3878_v42 = vadd.f32 %v3877_v16, %v3876_v14  ;;  %v3879_v19 = vpop.f32.mrb[30].mxu0 }
 0x1fa   : > { %v3900_v18 = vadd.f32 %v3899_v17, %v3898_v15  ;;  %v3901_v20 = vpop.f32.mrb[30].mxu1  ;;  %v3880_v21 = vpop.f32.mrb[31].mxu0 }
 0x1fb   : > { %v3902_v22 = vpop.f32.mrb[31].mxu1  ;;  %v3094_v23 = vadd.f32 %v3878_v42, %v3054_v13  ;;  %3145 = sbr.rel (%p3547_p2) target bundleno = 524 (0x20c), region = 40 }
 0x1fd   : > { %v3134_v25 = vadd.f32 %v3900_v18, %v3094_v23 }
 0x1ff   : > { %v3139_v26 = vadd.f32 %v3134_v25, %v266_v24 }
 0x201   : > { %3141 = vst.msk [vmem:[%s4446_s23] sm:$0xf] %vm3140_vm1, %v3139_v26 }
 0x208   : > { %v3146_v27 = vld [vmem:[%s4446_s23] sm:$0xf] }
 0x209   : > { %v3148_v29 = vadd.f32 %v3147_v28, %v3146_v27 }
 0x20b   : > { %3149 = vst.msk [vmem:[%s4446_s23] sm:$0xf] %vm3140_vm1, %v3148_v29 }
 0x20c PF: > { %s3549_s4 = sshll.u32 %s4323_s16, 6  ;;  %s3165_s7 = sshll.u32 %s4446_s23, 4  ;;  %s3166_s7 = int_to_ptr.vmem [resolvable:$true] %s3165_s7 }
 0x20d   : > { %s4744_s15 = scalar_lea.hbm %s4797_s3, %s3549_s4  ;;  %s4803_s8 = sand.u32 1, %s4311_s13  }
 0x20e   : > { %s3151_s9 = scalar_lea.sflag [#allocation3], %s4803_s8  ;;  %s4241_s10 = scalar_lea.vmem %s3166_s7, 64 }
 0x20f   : > { %p4242_p4 = scmp.ne.s32.totalorder %s3166_s7, %s4241_s10  ;;  %s4339_s11 = smov [#allocation2]  }
 0x210   : > { %s4245_s20 = sshll.u32 %s4339_s11, 4  ;;  %s4246_s20 = int_to_ptr.vmem [resolvable:$false] %s4245_s20 }
 0x211   : > { %p4243_p5 = pnand %p4242_p4, %p4409_p3  ;;  %s4247_s21 = scalar_lea.vmem %s4246_s20, 128 }
 0x212   : > { %p4248_p7 = scmp.lt.s32.totalorder %s3166_s7, %s4246_s20  ;;  %p4249_p8 = scmp.lt.s32.totalorder %s4247_s21, %s4241_s10 }
 0x213   : > { %p4244_p6 = pneg %p4243_p5 }
 0x214   : > { %p4250_p10 = por %p4249_p8, %p4248_p7 }
 0x216   : > { %p4251_p11 = pnand %p4250_p10, %p4244_p6 }
 0x218   : > { %4254 = shalt.err (!%p4251_p11)
}
 0x219   : > { %s4255_s16 = scalar_lea.hbm %s4744_s15, 64  ;;  %s4259_s27 = scalar_lea.hbm %s4797_s3, 128 }
 0x21a   : > { %p4256_p12 = scmp.ne.s32.totalorder %s4744_s15, %s4255_s16  ;;  %p4260_p1 = scmp.lt.u32.totalorder %s4744_s15, %s4797_s3 }
 0x21b   : > { %p4261_p2 = scmp.lt.u32.totalorder %s4259_s27, %s4255_s16  ;;  %p4263_p5 = scmp.lt.u32.totalorder %s4255_s16, %s4744_s15 }
 0x21c   : > { %p4257_p13 = pnand %p4256_p12, %p4409_p3 }
 0x21d   : > { %p4262_p4 = por %p4261_p2, %p4260_p1 }
 0x21e   : > { %p4258_p0 = pneg %p4257_p13 }
 0x21f   : > { %p4264_p6 = por %p4263_p5, %p4262_p4 }
 0x221   : > { %p4265_p7 = pnand %p4264_p6, %p4258_p0 }
 0x223   : > { %4268 = shalt.err (!%p4265_p7)
}
 0x224   : > { %3904 = dma.vmem_to_hbm [thread:$0]  (%p4409_p3), %s3166_s7, 64, %s4744_s15, %s3151_s9  }
 0x225 PF: > { %p3910_p8 = scmp.ge.s32.totalorder %s4335_s19, 2  ;;  %s3177_s4 = sand.u32 1, %s4307_s12  }
 0x226   : > { %s3178_s5 = scalar_lea.sflag [#allocation3], %s3177_s4 }
 0x227   : > { %p3907_p10 = pnand %p3910_p8, %p4419_p9 }
 0x229   : > { %4302 = dma.done.wait (!%p3907_p10), %s3178_s5, 64  }
 0x22a   : > { %4304 = vsyncadd (!%p3907_p10), %s3178_s5, 4294967232  ;;  %s16_s19 = sadd.s32 1, %s4335_s19   ;;  %s4804_s24 = sld [smem:[#allocation5_spill]] }
 0x22b   : > { %p13_p11 = scmp.ge.s32.totalorder %s16_s19, 6   ;;  %s4805_s12 = smov %s4311_s13 }
 0x22c   : > { %s4806_s13 = smov %s4315_s14  ;;  %s4807_s14 = smov %s4427_s28 }
 0x22d   : > { %s4808_s15 = smov %s4327_s17  ;;  %s4809_s16 = smov %s4331_s18 }
 0x22e   : > { %s4810_s17 = smov %s4813_s22  ;;  %15 = sbr.rel (!%p13_p11) target bundleno = 5 (0x5), region = 81 }
 0x230   : > { %s4811_s18 = smov %s4804_s24 }
 0x235   :  { %3183 = vsyncpa [#allocation3], 1 }
 0x236   :  { %3185 = vsyncpa [#allocation3 + $0x1], 1 }

</bundles_post_ra>
